<compile_context>
chip_gen: v5e
topology: v5e:2x2
jax: 0.10.0
libtpu: 0.0.40
codegen_flags: <defaults>
</compile_context>

<pallas_src>
import functools

import jax
import jax.numpy as jnp
from jax import lax
from jax.experimental import pallas as pl
from jax.experimental.pallas import tpu as pltpu

LANE = 128


def _round_up(x, m):
    return (x + m - 1) // m * m


@functools.lru_cache(maxsize=1)
def _vmem_limit_bytes():
    # Generation-aware budget: v5e/v6e have 128 MiB physical VMEM, v7x 64 MiB.
    try:
        cap = int(pltpu.get_tpu_info().vmem_capacity_bytes)
    except Exception:
        cap = 64 * 1024 * 1024
    return max(min(cap * 3 // 4, 96 * 1024 * 1024), 32 * 1024 * 1024)


def _compiler_params():
    return pltpu.CompilerParams(
        dimension_semantics=("parallel",),       # batch tiles are independent
        vmem_limit_bytes=_vmem_limit_bytes(),
    )


def _pick_batch_block(n, per_image_bytes, budget_bytes):
    """Largest divisor of n whose per-step VMEM estimate fits the budget."""
    nb = 1
    for cand in range(1, n + 1):
        if n % cand == 0 and cand * per_image_bytes <= budget_bytes:
            nb = cand
    return nb


# -----------------------------------------------------------------------------
# Fused kernel factory.  All spatial/channel sizes and structural flags are
# Python-static, so the body specializes at trace time.
# -----------------------------------------------------------------------------
def _make_fused_kernel(*, NB, Ho, Wo, Cin, Cp, conv1_tapped, has_projection,
                       proj_from_xp, compute_dtype):
    M = NB * Ho * Wo

    def halo_pad(o):
        # (NB, Ho, Wo, Cp) -> (NB, Ho+2, Wo+2, Cp) with a zero border (pad=1).
        zr = jnp.zeros((NB, 1, Wo, Cp), o.dtype)
        o = jnp.concatenate([zr, o, zr], axis=1)
        zc = jnp.zeros((NB, Ho + 2, 1, Cp), o.dtype)
        return jnp.concatenate([zc, o, zc], axis=2)

    def taps_3x3(p, c):
        # p: (NB, Ho+2, Wo+2, c) -> (M, 9*c); column order (kh, kw, channel),
        # matching the folded weight layout.
        cols = []
        for kh in range(3):
            for kw in range(3):
                cols.append(p[:, kh:kh + Ho, kw:kw + Wo, :].reshape(M, c))
        return jnp.concatenate(cols, axis=-1)

    def kernel(*refs):
        it = iter(refs)
        a1_ref = next(it)
        w1_ref = next(it)
        b1_ref = next(it)
        w2_ref = next(it)
        b2_ref = next(it)
        ws_ref = next(it) if has_projection else None
        xs_ref = next(it) if (has_projection and not proj_from_xp) else None
        out_ref = next(it)

        a1 = a1_ref[...]

        # ---- conv1 (+ folded BN1) + ReLU: one MXU matmul, K = 9*Cin ---------
        if conv1_tapped:
            taps1 = a1.reshape(M, 9 * Cin)          # wrapper-built taps (stride 2)
        else:
            taps1 = taps_3x3(a1, Cin)               # in-kernel taps (stride 1)
        out1 = jnp.dot(taps1, w1_ref[...], preferred_element_type=jnp.float32)
        out1 = jnp.maximum(out1 + b1_ref[...], 0.0)

        # ---- conv2 (+ folded BN2): out1 never leaves the chip ----------------
        p1 = halo_pad(out1.reshape(NB, Ho, Wo, Cp).astype(compute_dtype))
        taps2 = taps_3x3(p1, Cp)                    # (M, 9*Cp)
        acc = jnp.dot(taps2, w2_ref[...], preferred_element_type=jnp.float32)
        acc = acc + b2_ref[...]                     # shortcut bias already folded in

        # ---- shortcut ---------------------------------------------------------
        if has_projection:
            if proj_from_xp:                        # stride==1: reuse input slab
                xs = a1[:, 1:Ho + 1, 1:Wo + 1, :].reshape(M, Cin)
            else:                                   # stride==2: strided input arg
                xs = xs_ref[...].reshape(M, Cin)
            acc = acc + jnp.dot(xs, ws_ref[...],
                                preferred_element_type=jnp.float32)
        else:                                       # identity: reuse input slab
            ident = a1[:, 1:Ho + 1, 1:Wo + 1, :].reshape(M, Cin)
            ident = ident.astype(jnp.float32)
            if Cp > Cin:
                ident = jnp.concatenate(
                    [ident, jnp.zeros((M, Cp - Cin), jnp.float32)], axis=-1)
            acc = acc + ident

        out_ref[...] = jnp.maximum(acc, 0.0).reshape(
            NB, Ho, Wo, Cp).astype(out_ref.dtype)

    return kernel


# -----------------------------------------------------------------------------
# Wrapper-side glue (plain JAX): BN folding into weights, padding, im2col
# (only for the stride-2 conv1 path).
# -----------------------------------------------------------------------------
def _fold_3x3_bn(w_oihw, scale, bias, cin_pad, cout_pad, compute_dtype):
    """OIHW 3x3 conv weight -> (9*cin_pad, cout_pad) matmul weight, BN folded."""
    cout, cin, kh, kw = w_oihw.shape
    w = jnp.transpose(w_oihw, (2, 3, 1, 0)) * scale[None, None, None, :]
    w = jnp.pad(w, ((0, 0), (0, 0), (0, cin_pad - cin), (0, cout_pad - cout)))
    wm = w.reshape(kh * kw * cin_pad, cout_pad).astype(compute_dtype)
    b = jnp.pad(bias, (0, cout_pad - cout)).reshape(1, cout_pad).astype(jnp.float32)
    return wm, b


def _fold_1x1_bn(w_oihw, scale, bias, cout_pad, compute_dtype):
    cout, cin = w_oihw.shape[:2]
    w = jnp.transpose(w_oihw[:, :, 0, 0], (1, 0)) * scale[None, :]   # (Cin, Cout)
    wm = jnp.pad(w, ((0, 0), (0, cout_pad - cout))).astype(compute_dtype)
    b = jnp.pad(bias, (0, cout_pad - cout)).reshape(1, cout_pad).astype(jnp.float32)
    return wm, b


def _im2col_3x3(x_nhwc, stride):
    """3x3 / pad=1 im2col -> (N, Ho, Wo, 9*C); only used for stride > 1."""
    n, h, w, c = x_nhwc.shape
    xp = jnp.pad(x_nhwc, ((0, 0), (1, 1), (1, 1), (0, 0)))
    ho = (h + 2 - 3) // stride + 1
    wo = (w + 2 - 3) // stride + 1
    cols = []
    for kh in range(3):
        for kw in range(3):
            cols.append(xp[:, kh:kh + (ho - 1) * stride + 1:stride,
                           kw:kw + (wo - 1) * stride + 1:stride, :])
    return jnp.concatenate(cols, axis=-1), ho, wo


def init_params(key, in_planes, planes, stride, eps=1e-5):
    ks = jax.random.split(key, 16)
    p = {"stride": stride, "planes": planes, "in_planes": in_planes}
    # Conv weights use the PyTorch OIHW shape convention.
    p["w1"] = 0.2 * jax.random.normal(ks[0], (planes, in_planes, 3, 3), jnp.float32)
    p["w2"] = 0.2 * jax.random.normal(ks[1], (planes, planes, 3, 3), jnp.float32)

    def bn_fold(kg, kb, km, kv, c):
        gamma = 1.0 + 0.1 * jax.random.normal(kg, (c,), jnp.float32)
        beta = 0.1 * jax.random.normal(kb, (c,), jnp.float32)
        mean = 0.1 * jax.random.normal(km, (c,), jnp.float32)
        var = jax.random.uniform(kv, (c,), jnp.float32, minval=0.5, maxval=1.5)
        scale = gamma / jnp.sqrt(var + eps)
        bias = beta - mean * scale
        return scale, bias

    p["scale1"], p["bias1"] = bn_fold(ks[2], ks[3], ks[4], ks[5], planes)
    p["scale2"], p["bias2"] = bn_fold(ks[6], ks[7], ks[8], ks[9], planes)
    p["has_projection"] = (stride != 1) or (in_planes != planes)
    if p["has_projection"]:
        p["ws"] = 0.2 * jax.random.normal(ks[10], (planes, in_planes, 1, 1),
                                          jnp.float32)
        p["scale_s"], p["bias_s"] = bn_fold(ks[11], ks[12], ks[13], ks[14], planes)
    return p


def basic_block_forward(params, x_nchw, compute_dtype=jnp.bfloat16):
    """Fused Pallas implementation.  Input/output are NCHW (PyTorch convention)."""
    stride = params["stride"]
    planes = params["planes"]
    has_projection = bool(params["has_projection"])
    conv1_tapped = stride != 1
    proj_from_xp = has_projection and not conv1_tapped
    assert has_projection or stride == 1

    # Cast to bf16 BEFORE any padding / tap formation (halves wrapper HBM bytes).
    x = jnp.transpose(x_nchw, (0, 2, 3, 1)).astype(compute_dtype)       # NHWC
    N, H, W, Cin = x.shape
    Cp = _round_up(planes, LANE)                    # lane-dense output channels
    Ho = (H + 2 - 3) // stride + 1
    Wo = (W + 2 - 3) // stride + 1

    # ---- folded weights / biases ---------------------------------------------
    w1m, b1 = _fold_3x3_bn(params["w1"], params["scale1"], params["bias1"],
                           Cin, Cp, compute_dtype)
    w2m, b2 = _fold_3x3_bn(params["w2"], params["scale2"], params["bias2"],
                           Cp, Cp, compute_dtype)
    wsm = None
    if has_projection:
        wsm, bs = _fold_1x1_bn(params["ws"], params["scale_s"], params["bias_s"],
                               Cp, compute_dtype)
        b2 = b2 + bs                         # fold shortcut BN bias into main bias

    # ---- conv1 input -----------------------------------------------------------
    if conv1_tapped:
        a1, ho2, wo2 = _im2col_3x3(x, stride)        # (N, Ho, Wo, 9*Cin) bf16
        assert (ho2, wo2) == (Ho, Wo)
    else:
        a1 = jnp.pad(x, ((0, 0), (1, 1), (1, 1), (0, 0)))   # halo'd (N, H+2, W+2, Cin)

    # ---- pick how many images per grid step (keeps per-step VMEM bounded) ------
    spatial = Ho * Wo
    per_img = (2 * (a1.shape[1] * a1.shape[2] * a1.shape[3]      # conv1 input (bf16)
                    + (Ho + 2) * (Wo + 2) * Cp                   # halo'd out1 (bf16)
                    + spatial * 9 * Cp                           # conv2 taps  (bf16)
                    + spatial * Cp)                              # output tile (bf16)
               + 8 * spatial * Cp)                               # f32 accumulators
    NB = _pick_batch_block(N, per_img,
                           budget_bytes=min(_vmem_limit_bytes() // 4,
                                            16 * 1024 * 1024))
    grid = (N // NB,)

    in_arrays = [a1, w1m, b1, w2m, b2]
    in_specs = [
        pl.BlockSpec((NB,) + a1.shape[1:], lambda i: (i, 0, 0, 0)),
        pl.BlockSpec(w1m.shape, lambda i: (0, 0)),       # VMEM-resident weights
        pl.BlockSpec(b1.shape, lambda i: (0, 0)),
        pl.BlockSpec(w2m.shape, lambda i: (0, 0)),
        pl.BlockSpec(b2.shape, lambda i: (0, 0)),
    ]
    if has_projection:
        in_arrays.append(wsm)
        in_specs.append(pl.BlockSpec(wsm.shape, lambda i: (0, 0)))
        if not proj_from_xp:
            xs = x[:, ::stride, ::stride, :]             # (N, Ho, Wo, Cin) bf16
            in_arrays.append(xs)
            in_specs.append(pl.BlockSpec((NB, Ho, Wo, Cin),
                                         lambda i: (i, 0, 0, 0)))

    kernel = _make_fused_kernel(
        NB=NB, Ho=Ho, Wo=Wo, Cin=Cin, Cp=Cp, conv1_tapped=conv1_tapped,
        has_projection=has_projection, proj_from_xp=proj_from_xp,
        compute_dtype=compute_dtype)

    out = pl.pallas_call(
        kernel,
        grid=grid,
        out_shape=jax.ShapeDtypeStruct((N, Ho, Wo, Cp), compute_dtype),
        in_specs=in_specs,
        out_specs=pl.BlockSpec((NB, Ho, Wo, Cp), lambda i: (i, 0, 0, 0)),
        compiler_params=_compiler_params(),
    )(*in_arrays)

    out = out[:, :, :, :planes].astype(jnp.float32)
    return jnp.transpose(out, (0, 3, 1, 2))              # -> NCHW, f32


# -----------------------------------------------------------------------------
# Pure-JAX f32 reference (correctness check)
# -----------------------------------------------------------------------------
def reference_forward(params, x_nchw):
    def conv(x, w, stride, pad):
        return lax.conv_general_dilated(
            x, w, (stride, stride), ((pad, pad), (pad, pad)),
            dimension_numbers=("NCHW", "OIHW", "NCHW"))

    def bn(x, scale, bias):
        return x * scale[None, :, None, None] + bias[None, :, None, None]

    s = params["stride"]
    out = jax.nn.relu(bn(conv(x_nchw, params["w1"], s, 1),
                         params["scale1"], params["bias1"]))
    out = bn(conv(out, params["w2"], 1, 1), params["scale2"], params["bias2"])
    if params["has_projection"]:
        sc = bn(conv(x_nchw, params["ws"], s, 0),
                params["scale_s"], params["bias_s"])
    else:
        sc = x_nchw
    return jax.nn.relu(out + sc)


if __name__ == "__main__":
    key = jax.random.PRNGKey(0)
    kx1, kp1, kx2, kp2, kx3, kp3 = jax.random.split(key, 6)

    def check(x, params, expect_shape):
        fwd = jax.jit(lambda xx: basic_block_forward(params, xx))
        out = jax.block_until_ready(fwd(x))
        assert out.shape == expect_shape, (out.shape, expect_shape)
        ref = reference_forward(params, x)
        err = float(jnp.max(jnp.abs(out - ref)))
        tol = 0.05 * (float(jnp.max(jnp.abs(ref))) + 1.0)   # bf16 operands, f32 accum
        assert err < tol, (err, tol)

    # Case 1: stride-2 projection shortcut (wrapper-tapped conv1, fused conv2).
    x1 = jax.random.normal(kx1, (2, 4, 16, 16), jnp.float32)
    p1 = init_params(kp1, in_planes=4, planes=8, stride=2)
    check(x1, p1, (2, 8, 8, 8))

    # Case 2: identity shortcut (fully in-kernel taps; shortcut reuses input slab).
    x2 = jax.random.normal(kx2, (2, 8, 16, 16), jnp.float32)
    p2 = init_params(kp2, in_planes=8, planes=8, stride=1)
    check(x2, p2, (2, 8, 16, 16))

    # Case 3: stride-1 projection shortcut (1x1 projection reuses input slab).
    x3 = jax.random.normal(kx3, (2, 4, 16, 16), jnp.float32)
    p3 = init_params(kp3, in_planes=4, planes=8, stride=1)
    check(x3, p3, (2, 8, 16, 16))

    print("KERNEL_OK")
</pallas_src>

<mosaic_0001>
module attributes {stable_mosaic.version = 11 : i64} {
  func.func @kernel(%arg0: i32, %arg1: memref<2x8x8x36xbf16, #tpu.memory_space<vmem>>, %arg2: memref<36x128xbf16, #tpu.memory_space<vmem>>, %arg3: memref<1x128xf32, #tpu.memory_space<vmem>>, %arg4: memref<1152x128xbf16, #tpu.memory_space<vmem>>, %arg5: memref<1x128xf32, #tpu.memory_space<vmem>>, %arg6: memref<4x128xbf16, #tpu.memory_space<vmem>>, %arg7: memref<2x8x8x4xbf16, #tpu.memory_space<vmem>>, %arg8: memref<2x8x8x128xbf16, #tpu.memory_space<vmem>>) attributes {dimension_semantics = [#tpu.dimension_semantics<parallel>], iteration_bounds = array<i64: 1>, scalar_prefetch = 0 : i64, scratch_operands = 0 : i64, tpu.core_type = #tpu.core_type<tc>, window_params = [{transform_indices = @transform_0, window_bounds = array<i64: 2, 8, 8, 36>}, {pipeline_mode = #tpu.pipeline_mode<synchronous>, transform_indices = @transform_1, window_bounds = array<i64: 36, 128>}, {pipeline_mode = #tpu.pipeline_mode<synchronous>, transform_indices = @transform_2, window_bounds = array<i64: 1, 128>}, {pipeline_mode = #tpu.pipeline_mode<synchronous>, transform_indices = @transform_3, window_bounds = array<i64: 1152, 128>}, {pipeline_mode = #tpu.pipeline_mode<synchronous>, transform_indices = @transform_4, window_bounds = array<i64: 1, 128>}, {pipeline_mode = #tpu.pipeline_mode<synchronous>, transform_indices = @transform_5, window_bounds = array<i64: 4, 128>}, {transform_indices = @transform_6, window_bounds = array<i64: 2, 8, 8, 4>}, {transform_indices = @transform_7, window_bounds = array<i64: 2, 8, 8, 128>}]} {
    %c0 = arith.constant 0 : index
    %c0_0 = arith.constant 0 : index
    %c0_1 = arith.constant 0 : index
    %c0_2 = arith.constant 0 : index
    %0 = vector.load %arg1[%c0, %c0_0, %c0_1, %c0_2] : memref<2x8x8x36xbf16, #tpu.memory_space<vmem>>, vector<2x8x8x36xbf16>
    %1 = vector.shape_cast %0 : vector<2x8x8x36xbf16> to vector<128x36xbf16>
    %c0_3 = arith.constant 0 : index
    %c0_4 = arith.constant 0 : index
    %2 = vector.load %arg2[%c0_3, %c0_4] : memref<36x128xbf16, #tpu.memory_space<vmem>>, vector<36x128xbf16>
    %cst = arith.constant dense<0.000000e+00> : vector<128x128xf32>
    %3 = tpu.matmul %1, %2, %cst {dimension_numbers = #tpu.dot_dimension_numbers<[1], [0], [0], [1], [0, 0, 1, 1], [], []>} : vector<128x36xbf16>, vector<36x128xbf16>, vector<128x128xf32> -> vector<128x128xf32>
    %c0_5 = arith.constant 0 : index
    %c0_6 = arith.constant 0 : index
    %4 = vector.load %arg3[%c0_5, %c0_6] : memref<1x128xf32, #tpu.memory_space<vmem>>, vector<1x128xf32>
    %5 = vector.broadcast %4 : vector<1x128xf32> to vector<128x128xf32>
    %6 = arith.addf %3, %5 : vector<128x128xf32>
    %cst_7 = arith.constant 0.000000e+00 : f32
    %7 = vector.broadcast %cst_7 : f32 to vector<128x128xf32>
    %8 = arith.maximumf %6, %7 : vector<128x128xf32>
    %9 = vector.shape_cast %8 : vector<128x128xf32> to vector<2x8x8x128xf32>
    %10 = arith.truncf %9 : vector<2x8x8x128xf32> to vector<2x8x8x128xbf16>
    %cst_8 = arith.constant 0.000000e+00 : bf16
    %11 = vector.broadcast %cst_8 : bf16 to vector<2x1x8x128xbf16>
    %12 = tpu.concatenate %11, %10, %11 in 1 : vector<2x1x8x128xbf16>, vector<2x8x8x128xbf16>, vector<2x1x8x128xbf16> -> vector<2x10x8x128xbf16>
    %cst_9 = arith.constant 0.000000e+00 : bf16
    %13 = vector.broadcast %cst_9 : bf16 to vector<2x10x1x128xbf16>
    %14 = tpu.concatenate %13, %12, %13 in 2 : vector<2x10x1x128xbf16>, vector<2x10x8x128xbf16>, vector<2x10x1x128xbf16> -> vector<2x10x10x128xbf16>
    %15 = vector.extract_strided_slice %14 {offsets = [0, 0, 0, 0], sizes = [2, 8, 8, 128], strides = [1, 1, 1, 1]} : vector<2x10x10x128xbf16> to vector<2x8x8x128xbf16>
    %16 = vector.shape_cast %15 : vector<2x8x8x128xbf16> to vector<128x128xbf16>
    %17 = vector.extract_strided_slice %14 {offsets = [0, 0, 1, 0], sizes = [2, 8, 8, 128], strides = [1, 1, 1, 1]} : vector<2x10x10x128xbf16> to vector<2x8x8x128xbf16>
    %18 = vector.shape_cast %17 : vector<2x8x8x128xbf16> to vector<128x128xbf16>
    %19 = vector.extract_strided_slice %14 {offsets = [0, 0, 2, 0], sizes = [2, 8, 8, 128], strides = [1, 1, 1, 1]} : vector<2x10x10x128xbf16> to vector<2x8x8x128xbf16>
    %20 = vector.shape_cast %19 : vector<2x8x8x128xbf16> to vector<128x128xbf16>
    %21 = vector.extract_strided_slice %14 {offsets = [0, 1, 0, 0], sizes = [2, 8, 8, 128], strides = [1, 1, 1, 1]} : vector<2x10x10x128xbf16> to vector<2x8x8x128xbf16>
    %22 = vector.shape_cast %21 : vector<2x8x8x128xbf16> to vector<128x128xbf16>
    %23 = vector.extract_strided_slice %14 {offsets = [0, 1, 1, 0], sizes = [2, 8, 8, 128], strides = [1, 1, 1, 1]} : vector<2x10x10x128xbf16> to vector<2x8x8x128xbf16>
    %24 = vector.shape_cast %23 : vector<2x8x8x128xbf16> to vector<128x128xbf16>
    %25 = vector.extract_strided_slice %14 {offsets = [0, 1, 2, 0], sizes = [2, 8, 8, 128], strides = [1, 1, 1, 1]} : vector<2x10x10x128xbf16> to vector<2x8x8x128xbf16>
    %26 = vector.shape_cast %25 : vector<2x8x8x128xbf16> to vector<128x128xbf16>
    %27 = vector.extract_strided_slice %14 {offsets = [0, 2, 0, 0], sizes = [2, 8, 8, 128], strides = [1, 1, 1, 1]} : vector<2x10x10x128xbf16> to vector<2x8x8x128xbf16>
    %28 = vector.shape_cast %27 : vector<2x8x8x128xbf16> to vector<128x128xbf16>
    %29 = vector.extract_strided_slice %14 {offsets = [0, 2, 1, 0], sizes = [2, 8, 8, 128], strides = [1, 1, 1, 1]} : vector<2x10x10x128xbf16> to vector<2x8x8x128xbf16>
    %30 = vector.shape_cast %29 : vector<2x8x8x128xbf16> to vector<128x128xbf16>
    %31 = vector.extract_strided_slice %14 {offsets = [0, 2, 2, 0], sizes = [2, 8, 8, 128], strides = [1, 1, 1, 1]} : vector<2x10x10x128xbf16> to vector<2x8x8x128xbf16>
    %32 = vector.shape_cast %31 : vector<2x8x8x128xbf16> to vector<128x128xbf16>
    %33 = tpu.concatenate %16, %18, %20, %22, %24, %26, %28, %30, %32 in 1 : vector<128x128xbf16>, vector<128x128xbf16>, vector<128x128xbf16>, vector<128x128xbf16>, vector<128x128xbf16>, vector<128x128xbf16>, vector<128x128xbf16>, vector<128x128xbf16>, vector<128x128xbf16> -> vector<128x1152xbf16>
    %c0_10 = arith.constant 0 : index
    %c0_11 = arith.constant 0 : index
    %34 = vector.load %arg4[%c0_10, %c0_11] : memref<1152x128xbf16, #tpu.memory_space<vmem>>, vector<1152x128xbf16>
    %cst_12 = arith.constant dense<0.000000e+00> : vector<128x128xf32>
    %35 = tpu.matmul %33, %34, %cst_12 {dimension_numbers = #tpu.dot_dimension_numbers<[1], [0], [0], [1], [0, 0, 1, 1], [], []>} : vector<128x1152xbf16>, vector<1152x128xbf16>, vector<128x128xf32> -> vector<128x128xf32>
    %c0_13 = arith.constant 0 : index
    %c0_14 = arith.constant 0 : index
    %36 = vector.load %arg5[%c0_13, %c0_14] : memref<1x128xf32, #tpu.memory_space<vmem>>, vector<1x128xf32>
    %37 = vector.broadcast %36 : vector<1x128xf32> to vector<128x128xf32>
    %38 = arith.addf %35, %37 : vector<128x128xf32>
    %c0_15 = arith.constant 0 : index
    %c0_16 = arith.constant 0 : index
    %c0_17 = arith.constant 0 : index
    %c0_18 = arith.constant 0 : index
    %39 = vector.load %arg7[%c0_15, %c0_16, %c0_17, %c0_18] : memref<2x8x8x4xbf16, #tpu.memory_space<vmem>>, vector<2x8x8x4xbf16>
    %40 = vector.shape_cast %39 : vector<2x8x8x4xbf16> to vector<128x4xbf16>
    %c0_19 = arith.constant 0 : index
    %c0_20 = arith.constant 0 : index
    %41 = vector.load %arg6[%c0_19, %c0_20] : memref<4x128xbf16, #tpu.memory_space<vmem>>, vector<4x128xbf16>
    %cst_21 = arith.constant dense<0.000000e+00> : vector<128x128xf32>
    %42 = tpu.matmul %40, %41, %cst_21 {dimension_numbers = #tpu.dot_dimension_numbers<[1], [0], [0], [1], [0, 0, 1, 1], [], []>} : vector<128x4xbf16>, vector<4x128xbf16>, vector<128x128xf32> -> vector<128x128xf32>
    %43 = arith.addf %38, %42 : vector<128x128xf32>
    %cst_22 = arith.constant 0.000000e+00 : f32
    %44 = vector.broadcast %cst_22 : f32 to vector<128x128xf32>
    %45 = arith.maximumf %43, %44 : vector<128x128xf32>
    %46 = vector.shape_cast %45 : vector<128x128xf32> to vector<2x8x8x128xf32>
    %47 = arith.truncf %46 : vector<2x8x8x128xf32> to vector<2x8x8x128xbf16>
    %c0_23 = arith.constant 0 : index
    %c0_24 = arith.constant 0 : index
    %c0_25 = arith.constant 0 : index
    %c0_26 = arith.constant 0 : index
    %48 = vector.load %arg8[%c0_23, %c0_24, %c0_25, %c0_26] : memref<2x8x8x128xbf16, #tpu.memory_space<vmem>>, vector<2x8x8x128xbf16>
    tpu.vector_store %arg8[%c0_23, %c0_24, %c0_25, %c0_26], %47 {strides = array<i32>} : memref<2x8x8x128xbf16, #tpu.memory_space<vmem>>, vector<2x8x8x128xbf16>,
    return
  }
  func.func @transform_0(%arg0: i32) -> (i32, i32, i32, i32) {
    %c0_i32 = arith.constant 0 : i32
    %c0_i32_0 = arith.constant 0 : i32
    %c0_i32_1 = arith.constant 0 : i32
    %c0_i32_2 = arith.constant 0 : i32
    return %arg0, %c0_i32, %c0_i32_0, %c0_i32_1 : i32, i32, i32, i32
  }
  func.func @transform_1(%arg0: i32) -> (i32, i32) {
    %c0_i32 = arith.constant 0 : i32
    %c0_i32_0 = arith.constant 0 : i32
    %c0_i32_1 = arith.constant 0 : i32
    return %c0_i32, %c0_i32_0 : i32, i32
  }
  func.func @transform_2(%arg0: i32) -> (i32, i32) {
    %c0_i32 = arith.constant 0 : i32
    %c0_i32_0 = arith.constant 0 : i32
    %c0_i32_1 = arith.constant 0 : i32
    return %c0_i32, %c0_i32_0 : i32, i32
  }
  func.func @transform_3(%arg0: i32) -> (i32, i32) {
    %c0_i32 = arith.constant 0 : i32
    %c0_i32_0 = arith.constant 0 : i32
    %c0_i32_1 = arith.constant 0 : i32
    return %c0_i32, %c0_i32_0 : i32, i32
  }
  func.func @transform_4(%arg0: i32) -> (i32, i32) {
    %c0_i32 = arith.constant 0 : i32
    %c0_i32_0 = arith.constant 0 : i32
    %c0_i32_1 = arith.constant 0 : i32
    return %c0_i32, %c0_i32_0 : i32, i32
  }
  func.func @transform_5(%arg0: i32) -> (i32, i32) {
    %c0_i32 = arith.constant 0 : i32
    %c0_i32_0 = arith.constant 0 : i32
    %c0_i32_1 = arith.constant 0 : i32
    return %c0_i32, %c0_i32_0 : i32, i32
  }
  func.func @transform_6(%arg0: i32) -> (i32, i32, i32, i32) {
    %c0_i32 = arith.constant 0 : i32
    %c0_i32_0 = arith.constant 0 : i32
    %c0_i32_1 = arith.constant 0 : i32
    %c0_i32_2 = arith.constant 0 : i32
    return %arg0, %c0_i32, %c0_i32_0, %c0_i32_1 : i32, i32, i32, i32
  }
  func.func @transform_7(%arg0: i32) -> (i32, i32, i32, i32) {
    %c0_i32 = arith.constant 0 : i32
    %c0_i32_0 = arith.constant 0 : i32
    %c0_i32_1 = arith.constant 0 : i32
    %c0_i32_2 = arith.constant 0 : i32
    return %arg0, %c0_i32, %c0_i32_0, %c0_i32_1 : i32, i32, i32, i32
  }
}

</mosaic_0001>

<bundles_post_ra>
// kernel: _lambda_.1
= control target key start
LH: loop header
LB: loop body
LE: loop exit
PB: predicated region body
PF: predicated region fallthrough
CT: control target
= control target key end

     0   :  { %vm132_vm0 = vcmask 1041408   ;;  %vm107_vm1 = vcmask 293888   ;;  %vm353_vm2 = vcmask 1040384   ;;  %vm354_vm3 = vsmask.f32 256  ;;  %s3696_s1 = inlined_call_operand.vmem [shape: bf16[36,128], index: 1, kind: input, shape index: {}]   ;;  %s3697_s2 = inlined_call_operand.vmem [shape: f32[1,128], index: 2, kind: input, shape index: {}]   ;;  %s3698_s0 = inlined_call_operand.vmem [shape: bf16[2,8,8,36], index: 0, kind: input, shape index: {}]   ;;  %s3699_s3 = inlined_call_operand.vmem [shape: bf16[1152,128], index: 3, kind: input, shape index: {}]   ;;  %s3700_s4 = inlined_call_operand.vmem [shape: f32[1,128], index: 4, kind: input, shape index: {}]   ;;  %s3701_s5 = inlined_call_operand.vmem [shape: bf16[4,128], index: 5, kind: input, shape index: {}]   ;;  %s3702_s6 = inlined_call_operand.vmem [shape: bf16[2,8,8,4], index: 6, kind: input, shape index: {}]   ;;  %s3703_s7 = inlined_call_operand.vmem [shape: bf16[2,8,8,128], index: 7, kind: output, shape index: {}]  }
   0x1   :  { %v47_v0 = vld [vmem:[%s3696_s1 + $0x10] sm:$0x3]  ;;  %v2557_v4 = vld [vmem:[%s3696_s1 + $0x8] sm:$0xff]  ;;  %v2556_v5 = vld [vmem:[%s3696_s1] sm:$0xff]  ;;  %v2705_v25 = vmov 0   ;;  %vm373_vm5 = vcmask 1044480  }
   0x2   :  { %v101_v1 = vunpack.c.l.b16 %v47_v0  ;;  %v2548_v6 = vld [vmem:[%s3698_s0] sm:$0xff]  ;;  %v2549_v7 = vld [vmem:[%s3698_s0 + $0x8] sm:$0xff]  ;;  %v2550_v8 = vld [vmem:[%s3698_s0 + $0x10] sm:$0xff]  ;;  %v220_v26 = vrot.slane %v2705_v25, 7  ;;  %vm374_vm6 = vsmask.f32 4352 }
   0x3   :  { %v2551_v9 = vld [vmem:[%s3698_s0 + $0x18] sm:$0xff]  ;;  %v2552_v10 = vld [vmem:[%s3698_s0 + $0x20] sm:$0xff]  ;;  %v2553_v11 = vld [vmem:[%s3698_s0 + $0x28] sm:$0xff]  ;;  %vm681_vm8 = vcmask 1042432   ;;  %vm682_vm9 = vcmask 1046532   ;;  %vm2010_vm14 = vcmask 31744  }
   0x4   :  { %v104_v2 = vpack.c.b16 %v101_v1, %v101_v1  ;;  %v2565_v12 = vld [vmem:[%s3699_s3 + $0x38] sm:$0xff]  ;;  %v2564_v14 = vld [vmem:[%s3699_s3 + $0x30] sm:$0xff]  ;;  %v2563_v15 = vld [vmem:[%s3699_s3 + $0x28] sm:$0xff]  ;;  %vm468_vm11 = vsmask.f32 3328 }
   0x5   :  { %v2589_v13 = vld [vmem:[%s3699_s3 + $0xf8] sm:$0xff]  ;;  %1512 = vmatpush.bf16.msra.mxu1 %v2565_v12  ;;  %2685 = vmatpush.bf16.msra.mxu3 %v2565_v12  ;;  %v2562_v16 = vld [vmem:[%s3699_s3 + $0x20] sm:$0xff]  ;;  %v2588_v17 = vld [vmem:[%s3699_s3 + $0xf0] sm:$0xff]  ;;  %vm469_vm12 = vsmask.f32 7440 }
   0x6   :  { %v134_v3 = vsel %vm132_vm0, %v104_v2, 0  ;;  %v2554_v18 = vld [vmem:[%s3698_s0 + $0x30] sm:$0xff]  ;;  %v2561_v19 = vld [vmem:[%s3699_s3 + $0x18] sm:$0xff]  ;;  %v2587_v20 = vld [vmem:[%s3699_s3 + $0xe8] sm:$0xff] }
   0x7   :  { %141 = vmatpush.bf16.msra.mxu0 %v134_v3  ;;  %v2560_v21 = vld [vmem:[%s3699_s3 + $0x10] sm:$0xff]  ;;  %v2586_v22 = vld [vmem:[%s3699_s3 + $0xe0] sm:$0xff]  ;;  %v2559_v23 = vld [vmem:[%s3699_s3 + $0x8] sm:$0xff] }
   0x8   :  { %v2585_v24 = vld [vmem:[%s3699_s3 + $0xd8] sm:$0xff]  ;;  %vm2820_vm4 = vmand %vm353_vm2, %vm354_vm3  ;;  %v2558_v30 = vld [vmem:[%s3699_s3] sm:$0xff] }
   0x9   :  { %1513 = vmatpush.bf16.msra.mxu1 %v2564_v14  ;;  %2686 = vmatpush.bf16.msra.mxu3 %v2564_v14  ;;  %v356_v28 = vsel %vm2820_vm4, 0, %v220_v26  ;;  %vm2826_vm7 = vmand %vm373_vm5, %vm374_vm6  ;;  %v2584_v31 = vld [vmem:[%s3699_s3 + $0xd0] sm:$0xff]  ;;  %v2555_v33 = vld [vmem:[%s3698_s0 + $0x38] sm:$0xff] }
   0xa   :  { %v376_v32 = vsel %vm2826_vm7, %v356_v28, 0  ;;  %v2573_v38 = vld [vmem:[%s3699_s3 + $0x78] sm:$0xff]  ;;  %v2583_v39 = vld [vmem:[%s3699_s3 + $0xc8] sm:$0xff]  ;;  %vm2858_vm10 = vmor %vm681_vm8, %vm682_vm9 }
   0xb   :  { %142 = vmatpush.bf16.msra.mxu0 %v2557_v4  ;;  %v2841_v34 = vunpack.c.l.b16 %v376_v32  ;;  %v409_v35 = vunpack.c.h.b16 %v376_v32  ;;  %2693 = vmatpush.bf16.msra.mxu2 %v2573_v38  ;;  %v2572_v43 = vld [vmem:[%s3699_s3 + $0x70] sm:$0xff]  ;;  %v2582_v44 = vld [vmem:[%s3699_s3 + $0xc0] sm:$0xff]  ;;  %v2571_v46 = vld [vmem:[%s3699_s3 + $0x68] sm:$0xff] }
   0xc   :  { %v2878_v47 = vld [vmem:[%s3697_s2] ss:$0 sm:$0xff]  ;;  %v2569_v52 = vld [vmem:[%s3699_s3 + $0x58] sm:$0xff]  ;;  %v2568_v55 = vld [vmem:[%s3699_s3 + $0x50] sm:$0xff] }
   0xd   :  { %1514 = vmatpush.bf16.msra.mxu1 %v2563_v15  ;;  %2687 = vmatpush.bf16.msra.mxu3 %v2563_v15  ;;  %v2843_v36 = vpack.c.b16 %v409_v35, %v409_v35  ;;  %v2847_v37 = vpack.c.b16 %v2841_v34, %v2841_v34  ;;  %v2570_v48 = vld [vmem:[%s3699_s3 + $0x60] sm:$0xff]  ;;  %v2567_v62 = vld [vmem:[%s3699_s3 + $0x48] sm:$0xff]  ;;  %vm2940_vm13 = vmor %vm468_vm11, %vm469_vm12 }
   0xe   :  { %v2628_v42 = vld [vmem:[%s3699_s3 + $0x230] sm:$0xff] }
   0xf   :  { %143 = vmatpush.bf16.msra.mxu0 %v2556_v5  ;;  %v2203_v40 = vrot.slane %v2847_v37, 9  ;;  %v686_v41 = vrot.slane %v2843_v36, 5  ;;  %2694 = vmatpush.bf16.msra.mxu2 %v2572_v43  ;;  %v2566_v5 = vld [vmem:[%s3699_s3 + $0x40] sm:$0xff] }
  0x11   :  { %1515 = vmatpush.bf16.msra.mxu1 %v2562_v16  ;;  %2688 = vmatpush.bf16.msra.mxu3 %v2562_v16  ;;  %v2870_v45 = vsel %vm2858_vm10, %v2203_v40, %v686_v41  ;;  %v481_v40 = vshll.u32 %v2843_v36, 16  ;;  %v2596_v41 = vld [vmem:[%s3699_s3 + $0x130] sm:$0xff]  ;;  %v2595_v36 = vld [vmem:[%s3699_s3 + $0x128] sm:$0xff] }
  0x12   :  { %2195 = vmatmul.msk.bf16.vlgmr.msra.gmra.mxu0 %vm107_vm1, %v2548_v6  ;;  %v472_v6 = vshrl.u32 %v2847_v37, 16 }
  0x13   :  { %1659 = vmatpush.bf16.msrb.mxu0 %v2589_v13  ;;  %2695 = vmatpush.bf16.msra.mxu2 %v2571_v46 }
  0x15   :  { %1516 = vmatpush.bf16.msra.mxu1 %v2561_v19  ;;  %2689 = vmatpush.bf16.msra.mxu3 %v2561_v19 }
  0x17   :  { %1660 = vmatpush.bf16.msrb.mxu0 %v2588_v17  ;;  %2696 = vmatpush.bf16.msra.mxu2 %v2570_v48 }
  0x19   :  { %1517 = vmatpush.bf16.msra.mxu1 %v2560_v21  ;;  %2690 = vmatpush.bf16.msra.mxu3 %v2560_v21 }
  0x1b   :  { %1661 = vmatpush.bf16.msrb.mxu0 %v2587_v20  ;;  %2697 = vmatpush.bf16.msra.mxu2 %v2569_v52 }
  0x1d   :  { %1518 = vmatpush.bf16.msra.mxu1 %v2559_v23  ;;  %2691 = vmatpush.bf16.msra.mxu3 %v2559_v23 }
  0x1f   :  { %1662 = vmatpush.bf16.msrb.mxu0 %v2586_v22  ;;  %2698 = vmatpush.bf16.msra.mxu2 %v2568_v55  ;;  %v2597_v22 = vld [vmem:[%s3699_s3 + $0x138] sm:$0xff] }
  0x21   :  { %1519 = vmatpush.bf16.msra.mxu1 %v2558_v30  ;;  %2692 = vmatpush.bf16.msra.mxu3 %v2558_v30 }
  0x22   :  { %2196 = vmatmul.msk.bf16.gmra.mxu0 %vm107_vm1, %v2549_v7 }
  0x23   :  { %1663 = vmatpush.bf16.msrb.mxu0 %v2585_v24  ;;  %2699 = vmatpush.bf16.msra.mxu2 %v2567_v62 }
  0x25   :  { %1561 = vmatpush.bf16.msrb.mxu1 %v2573_v38 }
  0x27   :  { %1664 = vmatpush.bf16.msrb.mxu0 %v2584_v31  ;;  %2700 = vmatpush.bf16.msra.mxu2 %v2566_v5 }
  0x29   :  { %1562 = vmatpush.bf16.msrb.mxu1 %v2572_v43 }
  0x2b   :  { %1665 = vmatpush.bf16.msrb.mxu0 %v2583_v39 }
  0x2d   :  { %1563 = vmatpush.bf16.msrb.mxu1 %v2571_v46 }
  0x2f   :  { %1666 = vmatpush.bf16.msrb.mxu0 %v2582_v44 }
  0x31   :  { %1564 = vmatpush.bf16.msrb.mxu1 %v2570_v48 }
  0x32   :  { %2197 = vmatmul.msk.bf16.gmra.mxu0 %vm107_vm1, %v2550_v8 }
  0x35   :  { %1565 = vmatpush.bf16.msrb.mxu1 %v2569_v52 }
  0x39   :  { %1566 = vmatpush.bf16.msrb.mxu1 %v2568_v55 }
  0x3d   :  { %1567 = vmatpush.bf16.msrb.mxu1 %v2567_v62 }
  0x41   :  { %1568 = vmatpush.bf16.msrb.mxu1 %v2566_v5 }
  0x42   :  { %2198 = vmatmul.msk.bf16.gmra.mxu0 %vm107_vm1, %v2551_v9  ;;  %v475_v9 = vshll.u32 %v2847_v37, 16 }
  0x44   :  { %v477_v19 = vrot.slane %v475_v9, 5 }
  0x52   :  { %2199 = vmatmul.msk.bf16.gmra.mxu0 %vm107_vm1, %v2552_v10 }
  0x62   :  { %2200 = vmatmul.msk.bf16.gmra.mxu0 %vm107_vm1, %v2553_v11 }
  0x72   :  { %2201 = vmatmul.msk.bf16.gmra.mxu0 %vm107_vm1, %v2554_v18  ;;  %v474_v18 = vrot.slane %v472_v6, 4 }
  0x74   :  { %v478_v39 = vor.u32 %v477_v19, %v474_v18 }
  0x82   :  { %2202 = vmatmul.msk.bf16.gmra.mxu0 %vm107_vm1, %v2555_v33 }
  0x8f   :  { %v145_v49 = vpop.f32.mrf.mxu0 }
  0x90   :  { %v146_v50 = vadd.f32 %v2878_v47, %v145_v49 }
  0x92   :  { %v185_v51 = vmax.f32 %v146_v50, 0.0 }
  0x94   :  { %v201_v53 = vpack.c.bf16 %v185_v51, %v185_v51 }
  0x96   :  { %v225_v54 = vshrl.u32 %v201_v53, 16  ;;  %v228_v58 = vshll.u32 %v201_v53, 16 }
  0x97   :  { %v147_v56 = vpop.f32.mrf.mxu0 }
  0x98   :  { %v227_v57 = vrot.slane %v225_v54, 7  ;;  %v148_v59 = vadd.f32 %v2878_v47, %v147_v56 }
  0x9a   :  { %v230_v60 = vor.u32 %v228_v58, %v227_v57  ;;  %v186_v61 = vmax.f32 %v148_v59, 0.0  ;;  %v479_v59 = vrot.slane %v478_v39, 4 }
  0x9c   :  { %v357_v63 = vsel %vm2820_vm4, 0, %v230_v60  ;;  %v202_v0 = vpack.c.bf16 %v186_v61, %v186_v61  ;;  %v483_v60 = vrot.slane %v481_v40, 5 }
  0x9d   :  { %v377_v1 = vsel %vm2826_vm7, %v357_v63, 0 }
  0x9e   :  { %v232_v2 = vshrl.u32 %v202_v0, 16  ;;  %v410_v3 = vunpack.c.l.b16 %v377_v1  ;;  %v411_v4 = vunpack.c.h.b16 %v377_v1  ;;  %v235_v7 = vshll.u32 %v202_v0, 16 }
  0x9f   :  { %v150_v8 = vpop.f32.mrf.mxu0 }
  0xa0   :  { %v234_v10 = vrot.slane %v232_v2, 7  ;;  %v151_v11 = vadd.f32 %v2878_v47, %v150_v8  ;;  %v440_v12 = vpack.c.b16 %v410_v3, %v410_v3  ;;  %v2904_v13 = vpack.c.b16 %v411_v4, %v411_v4  ;;  %v2594_v8 = vld [vmem:[%s3699_s3 + $0x120] sm:$0xff] }
  0xa1   :  { %v790_v14 = vpack.c.b16 %v410_v3, %v2841_v34 }
  0xa2   :  { %v237_v15 = vor.u32 %v235_v7, %v234_v10  ;;  %v187_v16 = vmax.f32 %v151_v11, 0.0  ;;  %v690_v17 = vrot.slane %v2904_v13, 5  ;;  %v486_v20 = vshrl.u32 %v440_v12, 16 }
  0xa3   :  { %1520 = vmatmul.bf16.vlgmr.msra.gmra.mxu1 %v790_v14  ;;  %v489_v21 = vshll.u32 %v440_v12, 16  ;;  %v2204_v23 = vrot.slane %v440_v12, 9  ;;  %v495_v61 = vshll.u32 %v2904_v13, 16 }
  0xa4   :  { %v358_v24 = vsel %vm2820_vm4, 0, %v237_v15  ;;  %v203_v25 = vpack.c.bf16 %v187_v16, %v187_v16  ;;  %v488_v28 = vrot.slane %v486_v20, 4  ;;  %1708 = vmatpush.bf16.msra.mxu1 %v2597_v22  ;;  %v2581_v22 = vld [vmem:[%s3699_s3 + $0xb8] sm:$0xff] }
  0xa5   :  { %v378_v26 = vsel %vm2826_vm7, %v358_v24, 0  ;;  %v2917_v30 = vsel %vm2858_vm10, %v2204_v23, %v690_v17  ;;  %v491_v35 = vrot.slane %v489_v21, 5  ;;  %v484_v17 = vsel %vm2940_vm13, %v479_v59, %v483_v60  ;;  %v2593_v24 = vld [vmem:[%s3699_s3 + $0x118] sm:$0xff]  ;;  %1610 = vmatpush.bf16.msrb.mxu3 %v2581_v22 }
  0xa6   :  { %v239_v31 = vshrl.u32 %v203_v25, 16  ;;  %v412_v32 = vunpack.c.l.b16 %v378_v26  ;;  %v413_v33 = vunpack.c.h.b16 %v378_v26  ;;  %v242_v37 = vshll.u32 %v203_v25, 16 }
  0xa7   :  { %v152_v38 = vpop.f32.mrf.mxu0  ;;  %v492_v52 = vor.u32 %v491_v35, %v488_v28  ;;  %v838_v63 = vunpack.c.l.b16 %v2917_v30  ;;  %v497_v21 = vrot.slane %v495_v61, 5  ;;  %v2627_v30 = vld [vmem:[%s3699_s3 + $0x228] sm:$0xff] }
  0xa8   :  { %v241_v43 = vrot.slane %v239_v31, 7  ;;  %v153_v44 = vadd.f32 %v2878_v47, %v152_v38  ;;  %v442_v46 = vpack.c.b16 %v412_v32, %v412_v32  ;;  %v868_v48 = vpack.c.b16 %v412_v32, %v410_v3  ;;  %1709 = vmatpush.bf16.msra.mxu1 %v2596_v41 }
  0xa9   :  { %v2924_v49 = vpack.c.b16 %v413_v33, %v413_v33  ;;  %v493_v5 = vrot.slane %v492_v52, 4  ;;  %v2970_v33 = vunpack.c.l.b16 %v484_v17  ;;  %v2592_v52 = vld [vmem:[%s3699_s3 + $0x110] sm:$0xff] }
  0xaa   :  { %v244_v50 = vor.u32 %v242_v37, %v241_v43  ;;  %v188_v51 = vmax.f32 %v153_v44, 0.0  ;;  %1667 = vmatmul.bf16.vlgmr.msrb.gmra.mxu0 %v868_v48  ;;  %v500_v53 = vshrl.u32 %v442_v46, 16  ;;  %v503_v54 = vshll.u32 %v442_v46, 16 }
  0xab   :  { %v2205_v55 = vrot.slane %v442_v46, 9  ;;  %v694_v56 = vrot.slane %v2924_v49, 5  ;;  %v509_v44 = vshll.u32 %v2924_v49, 16 }
  0xac   :  { %v359_v57 = vsel %vm2820_vm4, 0, %v244_v50  ;;  %v204_v58 = vpack.c.bf16 %v188_v51, %v188_v51  ;;  %1710 = vmatpush.bf16.msra.mxu1 %v2595_v36  ;;  %v502_v9 = vrot.slane %v500_v53, 4  ;;  %v505_v10 = vrot.slane %v503_v54, 5 }
  0xad   :  { %v379_v62 = vsel %vm2826_vm7, %v359_v57, 0  ;;  %v695_v0 = vsel %vm2858_vm10, %v2205_v55, %v694_v56 }
  0xae   :  { %v246_v1 = vshrl.u32 %v204_v58, 16  ;;  %v414_v2 = vunpack.c.l.b16 %v379_v62  ;;  %v415_v3 = vunpack.c.h.b16 %v379_v62  ;;  %v249_v6 = vshll.u32 %v204_v58, 16 }
  0xaf   :  { %v155_v7 = vpop.f32.mrf.mxu0  ;;  %v839_v11 = vunpack.c.l.b16 %v695_v0  ;;  %v506_v23 = vor.u32 %v505_v10, %v502_v9  ;;  %v2605_v10 = vld [vmem:[%s3699_s3 + $0x178] sm:$0xff] }
  0xb0   :  { %v248_v12 = vrot.slane %v246_v1, 7  ;;  %v156_v13 = vadd.f32 %v2878_v47, %v155_v7  ;;  %v444_v14 = vpack.c.b16 %v414_v2, %v414_v2  ;;  %v2948_v15 = vpack.c.b16 %v415_v3, %v415_v3  ;;  %1711 = vmatpush.bf16.msra.mxu1 %v2594_v8  ;;  %v2591_v3 = vld [vmem:[%s3699_s3 + $0x108] sm:$0xff]  ;;  %1757 = vmatpush.bf16.msrb.mxu2 %v2605_v10 }
  0xb1   :  { %v2950_v16 = vpack.c.b16 %v414_v2, %v412_v32  ;;  %v2956_v18 = vpack.c.b16 %v839_v11, %v838_v63  ;;  %v498_v32 = vsel %vm2940_vm13, %v493_v5, %v497_v21  ;;  %v2979_v51 = vrot.slane %v506_v23, 4 }
  0xb2   :  { %v251_v19 = vor.u32 %v249_v6, %v248_v12  ;;  %v189_v20 = vmax.f32 %v156_v13, 0.0  ;;  %v2206_v25 = vrot.slane %v444_v14, 9  ;;  %v698_v26 = vrot.slane %v2948_v15, 5 }
  0xb3   :  { %1525 = vmatmul.bf16.gmra.mxu1 %v2950_v16  ;;  %v514_v37 = vshrl.u32 %v444_v14, 16  ;;  %v517_v38 = vshll.u32 %v444_v14, 16  ;;  %v2977_v50 = vunpack.c.l.b16 %v498_v32  ;;  %v2989_v1 = vrot.slane %v509_v44, 5 }
  0xb4   :  { %v205_v28 = vpack.c.bf16 %v189_v20, %v189_v20  ;;  %v360_v31 = vsel %vm2820_vm4, 0, %v251_v19  ;;  %1712 = vmatpush.bf16.msra.mxu1 %v2593_v24  ;;  %v699_v39 = vsel %vm2858_vm10, %v2206_v25, %v698_v26  ;;  %v523_v26 = vshll.u32 %v2948_v15, 16 }
  0xb5   :  { %v380_v35 = vsel %vm2826_vm7, %v360_v31, 0  ;;  %v840_v36 = vunpack.c.l.b16 %v699_v39  ;;  %v516_v58 = vrot.slane %v514_v37, 4  ;;  %v519_v49 = vrot.slane %v517_v38, 5 }
  0xb6   :  { %v253_v40 = vshrl.u32 %v205_v28, 16  ;;  %v416_v41 = vunpack.c.l.b16 %v380_v35  ;;  %v417_v43 = vunpack.c.h.b16 %v380_v35  ;;  %v256_v46 = vshll.u32 %v205_v28, 16  ;;  %v2590_v28 = vld [vmem:[%s3699_s3 + $0x100] sm:$0xff] }
  0xb7   :  { %v157_v48 = vpop.f32.mrf.mxu0  ;;  %v2987_v59 = vpack.c.b16 %v840_v36, %v839_v11  ;;  %v2580_v11 = vld [vmem:[%s3699_s3 + $0xb0] sm:$0xff]  ;;  %v821_v13 = vpack.c.b16 %v2977_v50, %v2970_v33  ;;  %v520_v14 = vor.u32 %v519_v49, %v516_v58  ;;  %v512_v22 = vsel %vm2940_vm13, %v2979_v51, %v2989_v1 }
  0xb8   :  { %v255_v53 = vrot.slane %v253_v40, 7  ;;  %v158_v54 = vadd.f32 %v2878_v47, %v157_v48  ;;  %v446_v55 = vpack.c.b16 %v416_v41, %v416_v41  ;;  %v2985_v56 = vpack.c.b16 %v417_v43, %v417_v43  ;;  %1713 = vmatpush.bf16.msra.mxu1 %v2592_v52  ;;  %1611 = vmatpush.bf16.msrb.mxu3 %v2580_v11 }
  0xb9   :  { %v869_v57 = vpack.c.b16 %v416_v41, %v414_v2  ;;  %v521_v43 = vrot.slane %v520_v14, 4 }
  0xba   :  { %v258_v60 = vor.u32 %v256_v46, %v255_v53  ;;  %v190_v61 = vmax.f32 %v158_v54, 0.0  ;;  %v528_v62 = vshrl.u32 %v446_v55, 16  ;;  %v531_v0 = vshll.u32 %v446_v55, 16 }
  0xbb   :  { %1672 = vmatmul.bf16.gmra.mxu0 %v869_v57  ;;  %v2207_v5 = vrot.slane %v446_v55, 9  ;;  %v702_v6 = vrot.slane %v2985_v56, 5  ;;  %v537_v40 = vshll.u32 %v2985_v56, 16  ;;  %v525_v54 = vrot.slane %v523_v26, 5 }
  0xbc   :  { %v361_v2 = vsel %vm2820_vm4, 0, %v258_v60  ;;  %v206_v7 = vpack.c.bf16 %v190_v61, %v190_v61  ;;  %v530_v8 = vrot.slane %v528_v62, 4  ;;  %v533_v9 = vrot.slane %v531_v0, 5  ;;  %1714 = vmatpush.bf16.msra.mxu1 %v2591_v3 }
  0xbd   :  { %v381_v12 = vsel %vm2826_vm7, %v361_v2, 0  ;;  %v703_v17 = vsel %vm2858_vm10, %v2207_v5, %v702_v6  ;;  %v539_v61 = vrot.slane %v537_v40, 5  ;;  %v526_v2 = vsel %vm2940_vm13, %v521_v43, %v525_v54 }
  0xbe   :  { %v260_v19 = vshrl.u32 %v206_v7, 16  ;;  %v418_v20 = vunpack.c.l.b16 %v381_v12  ;;  %v419_v21 = vunpack.c.h.b16 %v381_v12  ;;  %v263_v23 = vshll.u32 %v206_v7, 16 }
  0xbf   :  { %v160_v24 = vpop.f32.mrf.mxu0  ;;  %v534_v25 = vor.u32 %v533_v9, %v530_v8  ;;  %v841_v31 = vunpack.c.l.b16 %v703_v17 }
  0xc0   :  { %v262_v32 = vrot.slane %v260_v19, 7  ;;  %v161_v35 = vadd.f32 %v2878_v47, %v160_v24  ;;  %v448_v37 = vpack.c.b16 %v418_v20, %v418_v20  ;;  %v449_v38 = vpack.c.b16 %v419_v21, %v419_v21  ;;  %1715 = vmatpush.bf16.msra.mxu1 %v2590_v28 }
  0xc1   :  { %v3018_v39 = vpack.c.b16 %v418_v20, %v416_v41  ;;  %v3021_v44 = vpack.c.b16 %v841_v31, %v840_v36  ;;  %v535_v53 = vrot.slane %v534_v25, 4  ;;  %v2604_v36 = vld [vmem:[%s3699_s3 + $0x170] sm:$0xff] }
  0xc2   :  { %v265_v46 = vor.u32 %v263_v23, %v262_v32  ;;  %v191_v15 = vmax.f32 %v161_v35, 0.0  ;;  %v542_v48 = vshrl.u32 %v448_v37, 16  ;;  %v545_v52 = vshll.u32 %v448_v37, 16  ;;  %1758 = vmatpush.bf16.msrb.mxu2 %v2604_v36 }
  0xc3   :  { %1530 = vmatmul.bf16.vlgmr.msra.gmra.mxu3 %v3018_v39  ;;  %1569 = vmatmul.bf16.vlgmr.msrb.gmra.mxu1 %v821_v13  ;;  %v2208_v55 = vrot.slane %v448_v37, 9  ;;  %v706_v57 = vrot.slane %v449_v38, 5  ;;  %v551_v62 = vshll.u32 %v449_v38, 16  ;;  %v540_v9 = vsel %vm2940_vm13, %v535_v53, %v539_v61 }
  0xc4   :  { %v207_v58 = vpack.c.bf16 %v191_v15, %v191_v15  ;;  %v362_v41 = vsel %vm2820_vm4, 0, %v265_v46  ;;  %v544_v56 = vrot.slane %v542_v48, 4  ;;  %v547_v49 = vrot.slane %v545_v52, 5  ;;  %v2579_v15 = vld [vmem:[%s3699_s3 + $0xa8] sm:$0xff] }
  0xc5   :  { %v382_v60 = vsel %vm2826_vm7, %v362_v41, 0  ;;  %v707_v0 = vsel %vm2858_vm10, %v2208_v55, %v706_v57  ;;  %v553_v23 = vrot.slane %v551_v62, 5  ;;  %v3042_v37 = vunpack.c.l.b16 %v540_v9  ;;  %1612 = vmatpush.bf16.msrb.mxu3 %v2579_v15 }
  0xc6   :  { %v267_v3 = vshrl.u32 %v207_v58, 16  ;;  %v420_v5 = vunpack.c.l.b16 %v382_v60  ;;  %v421_v6 = vunpack.c.h.b16 %v382_v60  ;;  %v270_v7 = vshll.u32 %v207_v58, 16 }
  0xc7   :  { %v162_v8 = vpop.f32.mrf.mxu0  ;;  %v548_v10 = vor.u32 %v547_v49, %v544_v56  ;;  %v842_v11 = vunpack.c.l.b16 %v707_v0  ;;  %v3053_v52 = vunpack.c.l.b16 %v526_v2  ;;  %v3066_v41 = vunpack.c.l.b16 %v512_v22 }
  0xc8   :  { %v269_v12 = vrot.slane %v267_v3, 7  ;;  %v163_v13 = vadd.f32 %v2878_v47, %v162_v8  ;;  %v450_v14 = vpack.c.b16 %v420_v5, %v420_v5  ;;  %v451_v17 = vpack.c.b16 %v421_v6, %v421_v6 }
  0xc9   :  { %v870_v19 = vpack.c.b16 %v420_v5, %v418_v20  ;;  %v549_v21 = vrot.slane %v548_v10, 4  ;;  %v3038_v24 = vpack.c.b16 %v842_v11, %v841_v31  ;;  %v3074_v51 = vpack.c.b16 %v3053_v52, %v3066_v41 }
  0xca   :  { %v272_v25 = vor.u32 %v270_v7, %v269_v12  ;;  %v192_v26 = vmax.f32 %v163_v13, 0.0  ;;  %v556_v28 = vshrl.u32 %v450_v14, 16  ;;  %v559_v32 = vshll.u32 %v450_v14, 16 }
  0xcb   :  { %1677 = vmatmul.bf16.gmra.mxu0 %v870_v19  ;;  %v554_v35 = vsel %vm2940_vm13, %v549_v21, %v553_v23  ;;  %v2209_v38 = vrot.slane %v450_v14, 9  ;;  %v710_v40 = vrot.slane %v451_v17, 5  ;;  %v565_v1 = vshll.u32 %v451_v17, 16  ;;  %v2578_v17 = vld [vmem:[%s3699_s3 + $0xa0] sm:$0xff] }
  0xcc   :  { %v363_v43 = vsel %vm2820_vm4, 0, %v272_v25  ;;  %v208_v20 = vpack.c.bf16 %v192_v26, %v192_v26  ;;  %v3046_v46 = vunpack.c.l.b16 %v554_v35  ;;  %v558_v31 = vrot.slane %v556_v28, 4  ;;  %1613 = vmatpush.bf16.msrb.mxu3 %v2578_v17 }
  0xcd   :  { %v383_v48 = vsel %vm2826_vm7, %v363_v43, 0  ;;  %v561_v53 = vrot.slane %v559_v32, 5  ;;  %v711_v54 = vsel %vm2858_vm10, %v2209_v38, %v710_v40  ;;  %v567_v26 = vrot.slane %v565_v1, 5 }
  0xce   :  { %v274_v55 = vshrl.u32 %v208_v20, 16  ;;  %v3059_v57 = vpack.c.b16 %v3046_v46, %v3042_v37  ;;  %v422_v58 = vunpack.c.l.b16 %v383_v48  ;;  %v277_v56 = vshll.u32 %v208_v20, 16 }
  0xcf   :  { %v165_v49 = vpop.f32.mrf.mxu0  ;;  %v423_v36 = vunpack.c.h.b16 %v383_v48  ;;  %v562_v60 = vor.u32 %v561_v53, %v558_v31  ;;  %v843_v61 = vunpack.c.l.b16 %v711_v54 }
  0xd0   :  { %v276_v62 = vrot.slane %v274_v55, 7  ;;  %v166_v0 = vadd.f32 %v2878_v47, %v165_v49  ;;  %1579 = vmatmul.bf16.vlgmr.msra.gmra.mxu2 %v3059_v57  ;;  %v452_v3 = vpack.c.b16 %v422_v58, %v422_v58  ;;  %v3070_v6 = vpack.c.b16 %v422_v58, %v420_v5 }
  0xd1   :  { %v453_v2 = vpack.c.b16 %v423_v36, %v423_v36  ;;  %v3076_v22 = vpack.c.b16 %v843_v61, %v842_v11  ;;  %v563_v12 = vrot.slane %v562_v60, 4  ;;  %v2603_v11 = vld [vmem:[%s3699_s3 + $0x168] sm:$0xff] }
  0xd2   :  { %v279_v7 = vor.u32 %v277_v56, %v276_v62  ;;  %v193_v8 = vmax.f32 %v166_v0, 0.0  ;;  %v570_v9 = vshrl.u32 %v452_v3, 16  ;;  %v573_v10 = vshll.u32 %v452_v3, 16  ;;  %1759 = vmatpush.bf16.msrb.mxu2 %v2603_v11 }
  0xd3   :  { %1535 = vmatmul.bf16.gmra.mxu3 %v3070_v6  ;;  %1574 = vmatmul.bf16.gmra.mxu1 %v3074_v51  ;;  %v2210_v13 = vrot.slane %v452_v3, 9  ;;  %v714_v5 = vrot.slane %v453_v2, 5  ;;  %v579_v28 = vshll.u32 %v453_v2, 16  ;;  %v568_v31 = vsel %vm2940_vm13, %v563_v12, %v567_v26 }
  0xd4   :  { %v209_v14 = vpack.c.bf16 %v193_v8, %v193_v8  ;;  %v364_v19 = vsel %vm2820_vm4, 0, %v279_v7  ;;  %v572_v21 = vrot.slane %v570_v9, 4  ;;  %v575_v23 = vrot.slane %v573_v10, 5 }
  0xd5   :  { %v384_v25 = vsel %vm2826_vm7, %v364_v19, 0  ;;  %v715_v32 = vsel %vm2858_vm10, %v2210_v13, %v714_v5  ;;  %v581_v60 = vrot.slane %v579_v28, 5  ;;  %v3112_v10 = vunpack.c.l.b16 %v568_v31 }
  0xd6   :  { %v281_v35 = vshrl.u32 %v209_v14, 16  ;;  %v3092_v38 = vunpack.c.l.b16 %v384_v25  ;;  %v747_v40 = vunpack.c.h.b16 %v384_v25  ;;  %v284_v43 = vshll.u32 %v209_v14, 16 }
  0xd7   :  { %v167_v20 = vpop.f32.mrf.mxu0  ;;  %v576_v15 = vor.u32 %v575_v23, %v572_v21  ;;  %v844_v48 = vunpack.c.l.b16 %v715_v32 }
  0xd8   :  { %v283_v53 = vrot.slane %v281_v35, 7  ;;  %v168_v54 = vadd.f32 %v2878_v47, %v167_v20  ;;  %v3099_v55 = vpack.c.b16 %v3092_v38, %v3092_v38  ;;  %v3101_v56 = vpack.c.b16 %v747_v40, %v747_v40 }
  0xd9   :  { %v871_v49 = vpack.c.b16 %v3092_v38, %v422_v58  ;;  %v577_v36 = vrot.slane %v576_v15, 4  ;;  %v3104_v62 = vpack.c.b16 %v844_v48, %v843_v61  ;;  %v2602_v61 = vld [vmem:[%s3699_s3 + $0x160] sm:$0xff]  ;;  %v886_v35 = vpack.c.b16 %v3066_v41, %v2977_v50  ;;  %v2577_v50 = vld [vmem:[%s3699_s3 + $0x98] sm:$0xff] }
  0xda   :  { %v286_v0 = vor.u32 %v284_v43, %v283_v53  ;;  %v194_v3 = vmax.f32 %v168_v54, 0.0  ;;  %v2218_v1 = vrot.slane %v3099_v55, 9  ;;  %v784_v7 = vrot.slane %v3101_v56, 5  ;;  %1760 = vmatpush.bf16.msrb.mxu2 %v2602_v61  ;;  %1614 = vmatpush.bf16.msrb.mxu3 %v2577_v50 }
  0xdb   :  { %1682 = vmatmul.bf16.gmra.mxu0 %v871_v49  ;;  %v582_v2 = vsel %vm2940_vm13, %v577_v36, %v581_v60 }
  0xdc   :  { %v365_v8 = vsel %vm2820_vm4, 0, %v286_v0  ;;  %v210_v9 = vpack.c.bf16 %v194_v3, %v194_v3  ;;  %v3114_v58 = vunpack.c.l.b16 %v582_v2  ;;  %v3123_v13 = vsel %vm2858_vm10, %v2218_v1, %v784_v7  ;;  %v1969_v1 = vld [vmem:[%s3701_s5] sm:$0x3] }
  0xdd   :  { %v385_v12 = vsel %vm2826_vm7, %v365_v8, 0  ;;  %v3704_v17 = vunpack.c.l.b16 %v3123_v13 }
  0xde   :  { %v288_v5 = vshrl.u32 %v210_v9, 16  ;;  %v3127_v14 = vpack.c.b16 %v3114_v58, %v3112_v10  ;;  %v424_v19 = vunpack.c.l.b16 %v385_v12  ;;  %v291_v21 = vshll.u32 %v210_v9, 16 }
  0xdf   :  { %v170_v23 = vpop.f32.mrf.mxu0  ;;  %v425_v11 = vunpack.c.h.b16 %v385_v12  ;;  %v3137_v43 = vpack.c.b16 %v3704_v17, %v844_v48 }
  0xe0   :  { %v290_v25 = vrot.slane %v288_v5, 7  ;;  %v171_v26 = vadd.f32 %v2878_v47, %v170_v23  ;;  %1584 = vmatmul.bf16.gmra.mxu2 %v3127_v14  ;;  %v454_v28 = vpack.c.b16 %v424_v19, %v424_v19  ;;  %v794_v32 = vpack.c.b16 %v424_v19, %v2841_v34 }
  0xe1   :  { %v455_v40 = vpack.c.b16 %v425_v11, %v425_v11 }
  0xe2   :  { %v293_v20 = vor.u32 %v291_v21, %v290_v25  ;;  %v195_v31 = vmax.f32 %v171_v26, 0.0  ;;  %v584_v15 = vshrl.u32 %v454_v28, 16  ;;  %v587_v53 = vshll.u32 %v454_v28, 16 }
  0xe3   :  { %1540 = vmatmul.bf16.gmra.mxu3 %v794_v32  ;;  %1716 = vmatmul.bf16.vlgmr.msra.gmra.mxu1 %v886_v35  ;;  %v2211_v54 = vrot.slane %v454_v28, 9  ;;  %v718_v49 = vrot.slane %v455_v40, 5  ;;  %v593_v48 = vshll.u32 %v455_v40, 16  ;;  %v3155_v26 = vsel %vm132_vm0, %v1969_v1, 0 }
  0xe4   :  { %v366_v36 = vsel %vm2820_vm4, 0, %v293_v20  ;;  %v211_v60 = vpack.c.bf16 %v195_v31, %v195_v31  ;;  %v586_v0 = vrot.slane %v584_v15, 4  ;;  %v589_v3 = vrot.slane %v587_v53, 5 }
  0xe5   :  { %v386_v41 = vsel %vm2826_vm7, %v366_v36, 0  ;;  %v3148_v2 = vsel %vm2858_vm10, %v2211_v54, %v718_v49  ;;  %v595_v32 = vrot.slane %v593_v48, 5  ;;  %v887_v54 = vpack.c.b16 %v3042_v37, %v3053_v52  ;;  %v2576_v37 = vld [vmem:[%s3699_s3 + $0x90] sm:$0xff] }
  0xe6   :  { %v295_v7 = vshrl.u32 %v211_v60, 16  ;;  %v426_v8 = vunpack.c.l.b16 %v386_v41  ;;  %v427_v9 = vunpack.c.h.b16 %v386_v41  ;;  %v298_v61 = vshll.u32 %v211_v60, 16  ;;  %v2601_v41 = vld [vmem:[%s3699_s3 + $0x158] sm:$0xff]  ;;  %1615 = vmatpush.bf16.msrb.mxu3 %v2576_v37 }
  0xe7   :  { %v172_v12 = vpop.f32.mrf.mxu0  ;;  %v590_v5 = vor.u32 %v589_v3, %v586_v0  ;;  %v755_v1 = vshrl.u32 %v3099_v55, 16  ;;  %1761 = vmatpush.bf16.msrb.mxu2 %v2601_v41 }
  0xe8   :  { %v297_v21 = vrot.slane %v295_v7, 7  ;;  %v173_v23 = vadd.f32 %v2878_v47, %v172_v12  ;;  %v456_v11 = vpack.c.b16 %v426_v8, %v426_v8  ;;  %v872_v25 = vpack.c.b16 %v426_v8, %v424_v19  ;;  %v2621_v19 = vld [vmem:[%s3699_s3 + $0x1f8] sm:$0xff] }
  0xe9   :  { %v591_v28 = vrot.slane %v590_v5, 4  ;;  %v457_v35 = vpack.c.b16 %v427_v9, %v427_v9  ;;  %1855 = vmatpush.bf16.msra.mxu0 %v2621_v19  ;;  %v3705_v5 = vunpack.c.l.b16 %v3148_v2 }
  0xea   :  { %v300_v40 = vor.u32 %v298_v61, %v297_v21  ;;  %v196_v20 = vmax.f32 %v173_v23, 0.0  ;;  %v598_v31 = vshrl.u32 %v456_v11, 16  ;;  %v601_v15 = vshll.u32 %v456_v11, 16 }
  0xeb   :  { %1687 = vmatmul.bf16.gmra.mxu0 %v872_v25  ;;  %v596_v53 = vsel %vm2940_vm13, %v591_v28, %v595_v32  ;;  %v2212_v49 = vrot.slane %v456_v11, 9  ;;  %v722_v36 = vrot.slane %v457_v35, 5  ;;  %v2620_v28 = vld [vmem:[%s3699_s3 + $0x1f0] sm:$0xff]  ;;  %v607_v19 = vshll.u32 %v457_v35, 16 }
  0xec   :  { %v367_v60 = vsel %vm2820_vm4, 0, %v300_v40  ;;  %v212_v0 = vpack.c.bf16 %v196_v20, %v196_v20  ;;  %v3166_v3 = vunpack.c.l.b16 %v596_v53  ;;  %v600_v50 = vrot.slane %v598_v31, 4 }
  0xed   :  { %v387_v52 = vsel %vm2826_vm7, %v367_v60, 0  ;;  %v603_v48 = vrot.slane %v601_v15, 5  ;;  %v3179_v7 = vsel %vm2858_vm10, %v2212_v49, %v722_v36  ;;  %1856 = vmatpush.bf16.msra.mxu0 %v2620_v28  ;;  %v758_v49 = vshll.u32 %v3099_v55, 16 }
  0xee   :  { %v302_v9 = vshrl.u32 %v212_v0, 16  ;;  %v825_v61 = vpack.c.b16 %v3166_v3, %v2970_v33  ;;  %v3183_v12 = vunpack.c.l.b16 %v387_v52  ;;  %v305_v21 = vshll.u32 %v212_v0, 16 }
  0xef   :  { %v175_v23 = vpop.f32.mrf.mxu0  ;;  %v429_v11 = vunpack.c.h.b16 %v387_v52  ;;  %v604_v25 = vor.u32 %v603_v48, %v600_v50  ;;  %v846_v32 = vunpack.c.l.b16 %v3179_v7  ;;  %v3202_v52 = vrot.slane %v755_v1, 4 }
  0xf0   :  { %v304_v40 = vrot.slane %v302_v9, 7  ;;  %v176_v20 = vadd.f32 %v2878_v47, %v175_v23  ;;  %1589 = vmatmul.bf16.gmra.mxu2 %v825_v61  ;;  %v458_v31 = vpack.c.b16 %v3183_v12, %v3183_v12  ;;  %v3194_v15 = vpack.c.b16 %v3183_v12, %v426_v8  ;;  %v2619_v8 = vld [vmem:[%s3699_s3 + $0x1e8] sm:$0xff] }
  0xf1   :  { %v459_v53 = vpack.c.b16 %v429_v11, %v429_v11  ;;  %v3199_v36 = vpack.c.b16 %v846_v32, %v3705_v5  ;;  %v605_v37 = vrot.slane %v604_v25, 4  ;;  %v609_v23 = vrot.slane %v607_v19, 5  ;;  %1857 = vmatpush.bf16.msra.mxu0 %v2619_v8  ;;  %v2618_v25 = vld [vmem:[%s3699_s3 + $0x1e0] sm:$0xff]  ;;  %v2599_v19 = vld [vmem:[%s3699_s3 + $0x148] sm:$0xff] }
  0xf2   :  { %v307_v60 = vor.u32 %v305_v21, %v304_v40  ;;  %v197_v0 = vmax.f32 %v176_v20, 0.0  ;;  %v612_v50 = vshrl.u32 %v458_v31, 16  ;;  %v615_v41 = vshll.u32 %v458_v31, 16  ;;  %v2600_v21 = vld [vmem:[%s3699_s3 + $0x150] sm:$0xff] }
  0xf3   :  { %1545 = vmatmul.bf16.gmra.mxu3 %v3194_v15  ;;  %1721 = vmatmul.bf16.gmra.mxu1 %v887_v54  ;;  %v2213_v35 = vrot.slane %v458_v31, 9  ;;  %v726_v55 = vrot.slane %v459_v53, 5  ;;  %v2575_v54 = vld [vmem:[%s3699_s3 + $0x88] sm:$0xff]  ;;  %v621_v11 = vshll.u32 %v459_v53, 16 }
  0xf4   :  { %v368_v48 = vsel %vm2820_vm4, 0, %v307_v60  ;;  %v213_v7 = vpack.c.bf16 %v197_v0, %v197_v0  ;;  %v614_v9 = vrot.slane %v612_v50, 4  ;;  %v617_v61 = vrot.slane %v615_v41, 5  ;;  %1762 = vmatpush.bf16.msrb.mxu2 %v2600_v21  ;;  %1616 = vmatpush.bf16.msrb.mxu3 %v2575_v54 }
  0xf5   :  { %v388_v1 = vsel %vm2826_vm7, %v368_v48, 0  ;;  %v3222_v28 = vsel %vm2858_vm10, %v2213_v35, %v726_v55  ;;  %v760_v60 = vrot.slane %v758_v49, 5  ;;  %v610_v50 = vsel %vm2940_vm13, %v605_v37, %v609_v23  ;;  %1858 = vmatpush.bf16.msra.mxu0 %v2618_v25 }
  0xf6   :  { %v309_v40 = vshrl.u32 %v213_v7, 16  ;;  %v430_v20 = vunpack.c.l.b16 %v388_v1  ;;  %v431_v31 = vunpack.c.h.b16 %v388_v1  ;;  %v312_v53 = vshll.u32 %v213_v7, 16 }
  0xf7   :  { %v177_v0 = vpop.f32.mrf.mxu0  ;;  %v618_v41 = vor.u32 %v617_v61, %v614_v9  ;;  %v847_v8 = vunpack.c.l.b16 %v3222_v28  ;;  %v623_v49 = vrot.slane %v621_v11, 5  ;;  %v3238_v23 = vunpack.c.l.b16 %v610_v50  ;;  %v2617_v11 = vld [vmem:[%s3699_s3 + $0x1d8] sm:$0xff] }
  0xf8   :  { %v311_v35 = vrot.slane %v309_v40, 7  ;;  %v178_v55 = vadd.f32 %v2878_v47, %v177_v0  ;;  %v460_v48 = vpack.c.b16 %v430_v20, %v430_v20  ;;  %v873_v21 = vpack.c.b16 %v430_v20, %v3183_v12  ;;  %1763 = vmatpush.bf16.msrb.mxu2 %v2599_v19 }
  0xf9   :  { %v619_v54 = vrot.slane %v618_v41, 4  ;;  %v461_v1 = vpack.c.b16 %v431_v31, %v431_v31  ;;  %v3234_v7 = vpack.c.b16 %v847_v8, %v846_v32  ;;  %v888_v12 = vpack.c.b16 %v3112_v10, %v3046_v46  ;;  %v2574_v32 = vld [vmem:[%s3699_s3 + $0x80] sm:$0xff]  ;;  %1859 = vmatpush.bf16.msra.mxu0 %v2617_v11 }
  0xfa   :  { %v314_v17 = vor.u32 %v312_v53, %v311_v35  ;;  %v198_v5 = vmax.f32 %v178_v55, 0.0  ;;  %v626_v37 = vshrl.u32 %v460_v48, 16  ;;  %v629_v9 = vshll.u32 %v460_v48, 16  ;;  %1617 = vmatpush.bf16.msrb.mxu3 %v2574_v32 }
  0xfb   :  { %1692 = vmatmul.bf16.gmra.mxu0 %v873_v21  ;;  %v624_v61 = vsel %vm2940_vm13, %v619_v54, %v623_v49  ;;  %v2214_v25 = vrot.slane %v460_v48, 9  ;;  %v761_v10 = vor.u32 %v760_v60, %v3202_v52  ;;  %v730_v50 = vrot.slane %v461_v1, 5  ;;  %v2616_v52 = vld [vmem:[%s3699_s3 + $0x1d0] sm:$0xff] }
  0xfc   :  { %v369_v40 = vsel %vm2820_vm4, 0, %v314_v17  ;;  %v214_v31 = vpack.c.bf16 %v198_v5, %v198_v5  ;;  %v3250_v19 = vunpack.c.l.b16 %v624_v61  ;;  %v628_v53 = vrot.slane %v626_v37, 4 }
  0xfd   :  { %v389_v0 = vsel %vm2826_vm7, %v369_v40, 0  ;;  %v631_v46 = vrot.slane %v629_v9, 5  ;;  %v764_v17 = vshll.u32 %v3101_v56, 16  ;;  %v3267_v60 = vsel %vm2858_vm10, %v2214_v25, %v730_v50  ;;  %1860 = vmatpush.bf16.msra.mxu0 %v2616_v52 }
  0xfe   :  { %v316_v41 = vshrl.u32 %v214_v31, 16  ;;  %v3257_v35 = vpack.c.b16 %v3250_v19, %v3238_v23  ;;  %v3259_v55 = vunpack.c.l.b16 %v389_v0  ;;  %v319_v5 = vshll.u32 %v214_v31, 16 }
  0xff   :  { %v180_v48 = vpop.f32.mrf.mxu0  ;;  %v433_v21 = vunpack.c.h.b16 %v389_v0  ;;  %v632_v54 = vor.u32 %v631_v46, %v628_v53  ;;  %v635_v11 = vshll.u32 %v461_v1, 16  ;;  %v762_v32 = vrot.slane %v761_v10, 4  ;;  %v2615_v1 = vld [vmem:[%s3699_s3 + $0x1c8] sm:$0xff] }
 0x100   :  { %v318_v49 = vrot.slane %v316_v41, 7  ;;  %v181_v37 = vadd.f32 %v2878_v47, %v180_v48  ;;  %1594 = vmatmul.bf16.gmra.mxu2 %v3257_v35  ;;  %v462_v56 = vpack.c.b16 %v3259_v55, %v3259_v55  ;;  %v3274_v9 = vpack.c.b16 %v3259_v55, %v430_v20  ;;  %v2598_v20 = vld [vmem:[%s3699_s3 + $0x140] sm:$0xff] }
 0x101   :  { %v463_v61 = vpack.c.b16 %v433_v21, %v433_v21  ;;  %v848_v40 = vunpack.c.l.b16 %v3267_v60  ;;  %v633_v47 = vrot.slane %v632_v54, 4  ;;  %v766_v50 = vrot.slane %v764_v17, 5  ;;  %1764 = vmatpush.bf16.msrb.mxu2 %v2598_v20  ;;  %1861 = vmatpush.bf16.msra.mxu0 %v2615_v1 }
 0x102   :  { %v321_v31 = vor.u32 %v319_v5, %v318_v49  ;;  %v199_v25 = vmax.f32 %v181_v37, 0.0  ;;  %v640_v53 = vshrl.u32 %v462_v56, 16  ;;  %v643_v0 = vshll.u32 %v462_v56, 16 }
 0x103   :  { %v734_v46 = vrot.slane %v463_v61, 5  ;;  %1550 = vmatmul.bf16.gmra.mxu3 %v3274_v9  ;;  %1726 = vmatmul.bf16.gmra.mxu1 %v888_v12  ;;  %v3286_v10 = vpack.c.b16 %v848_v40, %v847_v8  ;;  %v637_v21 = vrot.slane %v635_v11, 5  ;;  %v649_v54 = vshll.u32 %v463_v61, 16  ;;  %v2614_v61 = vld [vmem:[%s3699_s3 + $0x1c0] sm:$0xff] }
 0x104   :  { %v370_v41 = vsel %vm2820_vm4, 0, %v321_v31  ;;  %v215_v5 = vpack.c.bf16 %v199_v25, %v199_v25  ;;  %v642_v48 = vrot.slane %v640_v53, 4  ;;  %v645_v12 = vrot.slane %v643_v0, 5 }
 0x105   :  { %v390_v17 = vsel %vm2826_vm7, %v370_v41, 0  ;;  %v2215_v52 = vrot.slane %v462_v56, 9  ;;  %v767_v28 = vsel %vm2940_vm13, %v762_v32, %v766_v50  ;;  %2045 = vmatpush.bf16.msra.mxu2 %v3155_v26  ;;  %v638_v25 = vsel %vm2940_vm13, %v633_v47, %v637_v21  ;;  %v2704_v32 = vld [vmem:[%s3697_s2] ss:$0 sm:$0xff]  ;;  %1862 = vmatpush.bf16.msra.mxu0 %v2614_v61  ;;  %v2613_v41 = vld [vmem:[%s3699_s3 + $0x1b8] sm:$0xff] }
 0x106   :  { %v323_v60 = vshrl.u32 %v215_v5, 16  ;;  %v434_v49 = vunpack.c.l.b16 %v390_v17  ;;  %v435_v37 = vunpack.c.h.b16 %v390_v17  ;;  %v326_v8 = vshll.u32 %v215_v5, 16  ;;  %1806 = vmatpush.bf16.msra.mxu3 %v2613_v41 }
 0x107   :  { %v182_v31 = vpop.f32.mrf.mxu0  ;;  %v646_v53 = vor.u32 %v645_v12, %v642_v48  ;;  %v735_v56 = vsel %vm2858_vm10, %v2215_v52, %v734_v46  ;;  %v651_v1 = vrot.slane %v649_v54, 5  ;;  %v3311_v52 = vunpack.c.l.b16 %v638_v25 }
 0x108   :  { %v325_v11 = vrot.slane %v323_v60, 7  ;;  %v183_v0 = vadd.f32 %v2704_v32, %v182_v31  ;;  %v464_v26 = vpack.c.b16 %v434_v49, %v434_v49  ;;  %v874_v50 = vpack.c.b16 %v434_v49, %v3259_v55 }
 0x109   :  { %v647_v20 = vrot.slane %v646_v53, 4  ;;  %v465_v47 = vpack.c.b16 %v435_v37, %v435_v37  ;;  %v849_v5 = vunpack.c.l.b16 %v735_v56  ;;  %v3321_v61 = vunpack.c.l.b16 %v767_v28 }
 0x10a   :  { %v328_v48 = vor.u32 %v326_v8, %v325_v11  ;;  %v200_v46 = vmax.f32 %v183_v0, 0.0  ;;  %v654_v12 = vshrl.u32 %v464_v26, 16  ;;  %v657_v17 = vshll.u32 %v464_v26, 16 }
 0x10b   :  { %1697 = vmatmul.bf16.gmra.mxu0 %v874_v50  ;;  %v652_v21 = vsel %vm2940_vm13, %v647_v20, %v651_v1  ;;  %v3313_v55 = vpack.c.b16 %v849_v5, %v848_v40  ;;  %v2216_v54 = vrot.slane %v464_v26, 9  ;;  %v738_v11 = vrot.slane %v465_v47, 5 }
 0x10c   :  { %v371_v60 = vsel %vm2820_vm4, 0, %v328_v48  ;;  %v216_v37 = vpack.c.bf16 %v200_v46, %v200_v46  ;;  %v3317_v31 = vunpack.c.l.b16 %v652_v21  ;;  %v656_v8 = vrot.slane %v654_v12, 4 }
 0x10d   :  { %v391_v53 = vsel %vm2826_vm7, %v371_v60, 0  ;;  %v659_v56 = vrot.slane %v657_v17, 5  ;;  %v739_v20 = vsel %vm2858_vm10, %v2216_v54, %v738_v11  ;;  %v889_v12 = vpack.c.b16 %v3321_v61, %v3114_v58 }
 0x10e   :  { %v330_v25 = vshrl.u32 %v216_v37, 16  ;;  %v3325_v40 = vpack.c.b16 %v3317_v31, %v3311_v52  ;;  %v436_v32 = vunpack.c.l.b16 %v391_v53  ;;  %v333_v0 = vshll.u32 %v216_v37, 16 }
 0x10f   :  { %v437_v26 = vunpack.c.h.b16 %v391_v53  ;;  %v660_v50 = vor.u32 %v659_v56, %v656_v8  ;;  %v850_v48 = vunpack.c.l.b16 %v739_v20  ;;  %v663_v17 = vshll.u32 %v465_v47, 16 }
 0x110   :  { %v332_v1 = vrot.slane %v330_v25, 7  ;;  %1599 = vmatmul.bf16.gmra.mxu2 %v3325_v40  ;;  %v466_v41 = vpack.c.b16 %v436_v32, %v436_v32  ;;  %v3330_v28 = vpack.c.b16 %v436_v32, %v434_v49  ;;  %v2629_v49 = vld [vmem:[%s3699_s3 + $0x238] sm:$0xff] }
 0x111   :  { %v467_v46 = vpack.c.b16 %v437_v26, %v437_v26  ;;  %v3334_v53 = vpack.c.b16 %v850_v48, %v849_v5  ;;  %v661_v54 = vrot.slane %v660_v50, 4  ;;  %1904 = vmatpush.bf16.msrb.mxu1 %v2629_v49 }
 0x112   :  { %v335_v21 = vor.u32 %v333_v0, %v332_v1  ;;  %v668_v60 = vshrl.u32 %v466_v41, 16  ;;  %v671_v37 = vshll.u32 %v466_v41, 16  ;;  %v2217_v11 = vrot.slane %v466_v41, 9 }
 0x113   :  { %v742_v8 = vrot.slane %v467_v46, 5  ;;  %1555 = vmatmul.bf16.gmra.mxu3 %v3330_v28  ;;  %1731 = vmatmul.bf16.gmra.mxu1 %v889_v12  ;;  %v677_v56 = vshll.u32 %v467_v46, 16  ;;  %v665_v0 = vrot.slane %v663_v17, 5 }
 0x114   :  { %v372_v58 = vsel %vm2820_vm4, 0, %v335_v21  ;;  %v670_v47 = vrot.slane %v668_v60, 4  ;;  %v673_v25 = vrot.slane %v671_v37, 5  ;;  %v2612_v60 = vld [vmem:[%s3699_s3 + $0x1b0] sm:$0xff] }
 0x115   :  { %v392_v5 = vsel %vm2826_vm7, %v372_v58, 0  ;;  %v743_v26 = vsel %vm2858_vm10, %v2217_v11, %v742_v8  ;;  %v666_v41 = vsel %vm2940_vm13, %v661_v54, %v665_v0  ;;  %v679_v46 = vrot.slane %v677_v56, 5  ;;  %1807 = vmatpush.bf16.msra.mxu3 %v2612_v60  ;;  %1905 = vmatpush.bf16.msrb.mxu1 %v2628_v42 }
 0x116   :  { %v3346_v50 = vunpack.c.l.b16 %v392_v5  ;;  %v749_v20 = vunpack.c.h.b16 %v392_v5  ;;  %v674_v1 = vor.u32 %v673_v25, %v670_v47  ;;  %v851_v27 = vunpack.c.l.b16 %v743_v26 }
 0x117   :  { %v819_v54 = vunpack.c.l.b16 %v666_v41  ;;  %v3369_v58 = vunpack.c.l.b16 %v2870_v45  ;;  %v890_v45 = vpack.c.b16 %v3238_v23, %v3166_v3  ;;  %v891_v23 = vpack.c.b16 %v3311_v52, %v3250_v19 }
 0x118   :  { %v752_v12 = vpack.c.b16 %v3346_v50, %v3346_v50  ;;  %v875_v29 = vpack.c.b16 %v3346_v50, %v436_v32  ;;  %v675_v21 = vrot.slane %v674_v1, 4  ;;  %v3353_v17 = vpack.c.b16 %v749_v20, %v749_v20  ;;  %v2611_v20 = vld [vmem:[%s3699_s3 + $0x1a8] sm:$0xff]  ;;  %v2624_v1 = vld [vmem:[%s3699_s3 + $0x210] sm:$0xff] }
 0x119   :  { %v3358_v37 = vpack.c.b16 %v851_v27, %v850_v48  ;;  %v852_v0 = vpack.c.b16 %v838_v63, %v3369_v58  ;;  %1808 = vmatpush.bf16.msra.mxu3 %v2611_v20  ;;  %1906 = vmatpush.bf16.msrb.mxu1 %v2627_v30  ;;  %v2626_v63 = vld [vmem:[%s3699_s3 + $0x220] sm:$0xff] }
 0x11a   :  { %v680_v8 = vsel %vm2940_vm13, %v675_v21, %v679_v46  ;;  %v2219_v49 = vrot.slane %v752_v12, 9  ;;  %v788_v32 = vrot.slane %v3353_v17, 5  ;;  %v769_v19 = vshrl.u32 %v752_v12, 16  ;;  %v3415_v46 = vld [vmem:[%s3700_s4] ss:$0 sm:$0xff] }
 0x11b   :  { %1702 = vmatmul.bf16.gmra.mxu0 %v875_v29  ;;  %v3362_v56 = vunpack.c.l.b16 %v680_v8  ;;  %v772_v52 = vshll.u32 %v752_v12, 16  ;;  %v2622_v12 = vld [vmem:[%s3699_s3 + $0x200] sm:$0xff] }
 0x11c   :  { %v3373_v48 = vsel %vm2858_vm10, %v2219_v49, %v788_v32  ;;  %v771_v29 = vrot.slane %v769_v19, 4 }
 0x11d   :  { %v3366_v11 = vpack.c.b16 %v3362_v56, %v819_v54  ;;  %v903_v47 = vunpack.c.l.b16 %v3373_v48  ;;  %1907 = vmatpush.bf16.msrb.mxu1 %v2626_v63  ;;  %v774_v21 = vrot.slane %v772_v52, 5 }
 0x11f   :  { %v3379_v5 = vpack.c.b16 %v903_v47, %v851_v27  ;;  %v2623_v27 = vld [vmem:[%s3699_s3 + $0x208] sm:$0xff]  ;;  %v775_v32 = vor.u32 %v774_v21, %v771_v29 }
 0x120   :  { %v1521_v25 = vpop.f32.mrf.mxu1  ;;  %1604 = vmatmul.bf16.gmra.mxu2 %v3366_v11 }
 0x121   :  { %v1522_v60 = vadd.f32 %v3415_v46, %v1521_v25  ;;  %v776_v25 = vrot.slane %v775_v32, 4 }
 0x123   :  { %1618 = vmatmul.bf16.vlgmr.msrb.gmra.mxu3 %v852_v0  ;;  %1736 = vmatmul.bf16.gmra.mxu1 %v890_v45  ;;  %v778_v0 = vshll.u32 %v3353_v17, 16 }
 0x125   :  { %v780_v30 = vrot.slane %v778_v0, 5 }
 0x128   :  { %v1523_v26 = vpop.f32.mrf.mxu1 }
 0x129   :  { %v1524_v42 = vadd.f32 %v3415_v46, %v1523_v26 }
 0x12b   :  { %1863 = vmatmul.bf16.vlgmr.msra.gmra.mxu0 %v3074_v51  ;;  %v2625_v51 = vld [vmem:[%s3699_s3 + $0x218] sm:$0xff] }
 0x12c   :  { %1908 = vmatpush.bf16.msrb.mxu1 %v2625_v51 }
 0x130   :  { %v1526_v3 = vpop.f32.mrf.mxu1  ;;  %1765 = vmatmul.bf16.vlgmr.msrb.gmra.mxu2 %v2956_v18  ;;  %1909 = vmatpush.bf16.msrb.mxu1 %v2624_v1  ;;  %v2610_v18 = vld [vmem:[%s3699_s3 + $0x1a0] sm:$0xff] }
 0x131   :  { %1809 = vmatpush.bf16.msra.mxu3 %v2610_v18 }
 0x133   :  { %1623 = vmatmul.bf16.gmra.mxu3 %v2987_v59  ;;  %1741 = vmatmul.bf16.gmra.mxu1 %v891_v23  ;;  %v1527_v23 = vadd.f32 %v3415_v46, %v1526_v3 }
 0x134   :  { %1910 = vmatpush.bf16.msrb.mxu1 %v2623_v27 }
 0x138   :  { %v1528_v41 = vpop.f32.mrf.mxu1  ;;  %1911 = vmatpush.bf16.msrb.mxu1 %v2622_v12 }
 0x139   :  { %v1529_v3 = vadd.f32 %v3415_v46, %v1528_v41 }
 0x13b   :  { %1868 = vmatmul.bf16.gmra.mxu0 %v3059_v57  ;;  %v892_v57 = vpack.c.b16 %v819_v54, %v3317_v31  ;;  %v781_v31 = vsel %vm2940_vm13, %v776_v25, %v780_v30 }
 0x13c   :  { %v3440_v54 = vunpack.c.l.b16 %v781_v31 }
 0x13e   :  { %v893_v1 = vpack.c.b16 %v3440_v54, %v3362_v56  ;;  %v924_v56 = vpack.c.b16 %v2970_v33, %v3321_v61 }
 0x140   :  { %v1570_v8 = vpop.f32.mrf.mxu1  ;;  %1770 = vmatmul.bf16.gmra.mxu2 %v3021_v44  ;;  %v2609_v44 = vld [vmem:[%s3699_s3 + $0x198] sm:$0xff] }
 0x141   :  { %v3426_v49 = vadd.f32 %v1570_v8, %v1522_v60  ;;  %1810 = vmatpush.bf16.msra.mxu3 %v2609_v44 }
 0x143   :  { %1628 = vmatmul.bf16.gmra.mxu3 %v3038_v24  ;;  %1746 = vmatmul.bf16.gmra.mxu1 %v892_v57  ;;  %v3714_v57 = vunpack.c.l.b16 %v3148_v2 }
 0x145   :  { %v856_v32 = vpack.c.b16 %v3714_v57, %v3369_v58 }
 0x146   :  { %v1531_v45 = vpop.f32.mrf.mxu3 }
 0x147   :  { %v1532_v18 = vadd.f32 %v3415_v46, %v1531_v45 }
 0x148   :  { %v1572_v20 = vpop.f32.mrf.mxu1 }
 0x149   :  { %v3435_v63 = vadd.f32 %v1572_v20, %v1524_v42  ;;  %v2607_v20 = vld [vmem:[%s3699_s3 + $0x188] sm:$0xff] }
 0x14b   :  { %1873 = vmatmul.bf16.gmra.mxu0 %v3127_v14  ;;  %v3450_v14 = vpop.f32.mrf.mxu0 }
 0x14e   :  { %v1533_v17 = vpop.f32.mrf.mxu3 }
 0x14f   :  { %v1534_v21 = vadd.f32 %v3415_v46, %v1533_v17 }
 0x150   :  { %v1575_v26 = vpop.f32.mrf.mxu1  ;;  %1775 = vmatmul.bf16.gmra.mxu2 %v3076_v22  ;;  %v2608_v22 = vld [vmem:[%s3699_s3 + $0x190] sm:$0xff] }
 0x151   :  { %v3444_v51 = vadd.f32 %v1575_v26, %v1527_v23  ;;  %1811 = vmatpush.bf16.msra.mxu3 %v2608_v22 }
 0x153   :  { %v1580_v4 = vpop.f32.mrf.mxu2  ;;  %1633 = vmatmul.bf16.gmra.mxu3 %v3104_v62  ;;  %1751 = vmatmul.bf16.gmra.mxu1 %v893_v1  ;;  %v3465_v8 = vpop.f32.mrf.mxu0 }
 0x154   :  { %v3452_v19 = vadd.f32 %v1580_v4, %v1532_v18 }
 0x155   :  { %1812 = vmatpush.bf16.msra.mxu3 %v2607_v20 }
 0x156   :  { %v1536_v52 = vpop.f32.mrf.mxu3 }
 0x157   :  { %v1537_v0 = vadd.f32 %v3415_v46, %v1536_v52 }
 0x158   :  { %v1577_v27 = vpop.f32.mrf.mxu1 }
 0x159   :  { %v3458_v29 = vadd.f32 %v1577_v27, %v1529_v3 }
 0x15b   :  { %v1582_v60 = vpop.f32.mrf.mxu2  ;;  %1878 = vmatmul.bf16.gmra.mxu0 %v924_v56  ;;  %v3475_v42 = vpop.f32.mrf.mxu0 }
 0x15c   :  { %v3463_v12 = vadd.f32 %v1582_v60, %v1534_v21 }
 0x15e   :  { %v1538_v41 = vpop.f32.mrf.mxu3 }
 0x160   :  { %1780 = vmatmul.bf16.gmra.mxu2 %v3137_v43  ;;  %v1539_v43 = vadd.f32 %v3415_v46, %v1538_v41  ;;  %v3488_v17 = vpop.f32.mrf.mxu1 }
 0x163   :  { %v1585_v45 = vpop.f32.mrf.mxu2  ;;  %1638 = vmatmul.bf16.gmra.mxu3 %v856_v32  ;;  %1912 = vmatmul.bf16.vlgmr.msrb.gmra.mxu1 %v2987_v59  ;;  %v3485_v59 = vpop.f32.mrf.mxu0 }
 0x164   :  { %v3473_v61 = vadd.f32 %v1585_v45, %v1537_v0 }
 0x166   :  { %v1541_v25 = vpop.f32.mrf.mxu3 }
 0x167   :  { %v1542_v31 = vadd.f32 %v3415_v46, %v1541_v25 }
 0x168   :  { %v3503_v3 = vpop.f32.mrf.mxu1 }
 0x16b   :  { %v1587_v2 = vpop.f32.mrf.mxu2  ;;  %1883 = vmatmul.bf16.gmra.mxu0 %v3257_v35  ;;  %v2606_v35 = vld [vmem:[%s3699_s3 + $0x180] sm:$0xff]  ;;  %v3499_v4 = vpop.f32.mrf.mxu0 }
 0x16c   :  { %v3482_v30 = vadd.f32 %v1587_v2, %v1539_v43  ;;  %1813 = vmatpush.bf16.msra.mxu3 %v2606_v35 }
 0x16e   :  { %v1543_v44 = vpop.f32.mrf.mxu3 }
 0x170   :  { %1785 = vmatmul.bf16.gmra.mxu2 %v3199_v36  ;;  %v1544_v36 = vadd.f32 %v3415_v46, %v1543_v44  ;;  %v1722_v60 = vpop.f32.mrf.mxu1  ;;  %v925_v44 = vpack.c.b16 %v2970_v33, %v3440_v54 }
 0x173   :  { %v1590_v23 = vpop.f32.mrf.mxu2  ;;  %1643 = vmatmul.bf16.gmra.mxu3 %v3234_v7  ;;  %1917 = vmatmul.bf16.gmra.mxu1 %v3038_v24  ;;  %v3511_v21 = vpop.f32.mrf.mxu0 }
 0x174   :  { %v3492_v26 = vadd.f32 %v1590_v23, %v1542_v31 }
 0x176   :  { %v1546_v1 = vpop.f32.mrf.mxu3 }
 0x177   :  { %v1547_v27 = vadd.f32 %v3415_v46, %v1546_v1 }
 0x178   :  { %v3520_v45 = vpop.f32.mrf.mxu1 }
 0x17b   :  { %v1592_v18 = vpop.f32.mrf.mxu2  ;;  %1888 = vmatmul.bf16.gmra.mxu0 %v3325_v40  ;;  %v3517_v0 = vpop.f32.mrf.mxu0 }
 0x17c   :  { %v3501_v52 = vadd.f32 %v1592_v18, %v1544_v36 }
 0x17e   :  { %v1548_v24 = vpop.f32.mrf.mxu3 }
 0x17f   :  { %v1549_v41 = vadd.f32 %v3415_v46, %v1548_v24 }
 0x180   :  { %1790 = vmatmul.bf16.gmra.mxu2 %v3286_v10  ;;  %v3534_v23 = vpop.f32.mrf.mxu1 }
 0x183   :  { %v1595_v22 = vpop.f32.mrf.mxu2  ;;  %1648 = vmatmul.bf16.gmra.mxu3 %v3313_v55  ;;  %1922 = vmatmul.bf16.gmra.mxu1 %v3104_v62  ;;  %v3715_v62 = vunpack.c.l.b16 %v3123_v13  ;;  %v3531_v31 = vpop.f32.mrf.mxu0 }
 0x184   :  { %v3509_v56 = vadd.f32 %v1595_v22, %v1547_v27 }
 0x185   :  { %v928_v25 = vpack.c.b16 %v3369_v58, %v3715_v62 }
 0x186   :  { %v1551_v40 = vpop.f32.mrf.mxu3 }
 0x187   :  { %v1552_v20 = vadd.f32 %v3415_v46, %v1551_v40 }
 0x188   :  { %v3544_v54 = vpop.f32.mrf.mxu1 }
 0x18b   :  { %v1597_v57 = vpop.f32.mrf.mxu2  ;;  %1893 = vmatmul.bf16.gmra.mxu0 %v3366_v11 }
 0x18c   :  { %v3515_v32 = vadd.f32 %v1597_v57, %v1549_v41 }
 0x18e   :  { %v1553_v10 = vpop.f32.mrf.mxu3 }
 0x190   :  { %1795 = vmatmul.bf16.gmra.mxu2 %v3334_v53  ;;  %v1554_v53 = vadd.f32 %v3415_v46, %v1553_v10  ;;  %v1732_v57 = vpop.f32.mrf.mxu1 }
 0x193   :  { %v1600_v43 = vpop.f32.mrf.mxu2  ;;  %1653 = vmatmul.bf16.gmra.mxu3 %v3358_v37  ;;  %1927 = vmatmul.bf16.gmra.mxu1 %v928_v25 }
 0x194   :  { %v3527_v11 = vadd.f32 %v1600_v43, %v1552_v20 }
 0x196   :  { %v1556_v2 = vpop.f32.mrf.mxu3 }
 0x197   :  { %v1557_v36 = vadd.f32 %v3415_v46, %v1556_v2 }
 0x198   :  { %v1734_v43 = vpop.f32.mrf.mxu1 }
 0x19b   :  { %v1602_v13 = vpop.f32.mrf.mxu2  ;;  %1898 = vmatmul.bf16.gmra.mxu0 %v925_v44 }
 0x19c   :  { %v3536_v1 = vadd.f32 %v1602_v13, %v1554_v53  ;;  %v1688_v53 = vpop.f32.mrf.mxu0 }
 0x19e   :  { %v1558_v35 = vpop.f32.mrf.mxu3 }
 0x19f   :  { %v1559_v22 = vadd.f32 %v3415_v46, %v1558_v35 }
 0x1a0   :  { %1800 = vmatmul.bf16.gmra.mxu2 %v3379_v5  ;;  %v2630_v5 = vld [vmem:[%s3702_s6] sm:$0xff] }
 0x1a3   :  { %v1605_v18 = vpop.f32.mrf.mxu2  ;;  %1814 = vmatmul.bf16.vlgmr.msra.gmra.mxu3 %v2950_v16  ;;  %1932 = vmatmul.bf16.gmra.mxu1 %v3234_v7 }
 0x1a4   :  { %v3542_v33 = vadd.f32 %v1605_v18, %v1557_v36 }
 0x1a6   :  { %v1619_v24 = vpop.f32.mrf.mxu3 }
 0x1a7   :  { %v1620_v27 = vadd.f32 %v1619_v24, %v3426_v49  ;;  %v1690_v24 = vpop.f32.mrf.mxu0 }
 0x1a9   :  { %v1669_v16 = vadd.f32 %v3450_v14, %v1620_v27 }
 0x1ab   :  { %v1607_v40 = vpop.f32.mrf.mxu2  ;;  %v1718_v49 = vadd.f32 %v3488_v17, %v1669_v16  ;;  %v2631_v17 = vld [vmem:[%s3702_s6 + $0x8] sm:$0xff] }
 0x1ac   :  { %v3548_v41 = vadd.f32 %v1607_v40, %v1559_v22 }
 0x1ae   :  { %v1621_v7 = vpop.f32.mrf.mxu3 }
 0x1af   :  { %v1622_v10 = vadd.f32 %v1621_v7, %v3435_v63  ;;  %v1693_v16 = vpop.f32.mrf.mxu0 }
 0x1b0   :  { %2540 = vmatmul.msk.bf16.vlgmr.msra.gmra.mxu2 %vm2010_vm14, %v2630_v5 }
 0x1b1   :  { %v1671_v25 = vadd.f32 %v3465_v8, %v1622_v10 }
 0x1b3   :  { %v1766_v62 = vpop.f32.mrf.mxu2  ;;  %1819 = vmatmul.bf16.gmra.mxu3 %v3018_v39  ;;  %1937 = vmatmul.bf16.gmra.mxu1 %v3313_v55  ;;  %v1720_v2 = vadd.f32 %v3503_v3, %v1671_v25 }
 0x1b4   :  { %v3559_v46 = vadd.f32 %v1766_v62, %v1718_v49 }
 0x1b6   :  { %v1624_v20 = vpop.f32.mrf.mxu3 }
 0x1b7   :  { %v1625_v14 = vadd.f32 %v1624_v20, %v3444_v51  ;;  %v1737_v51 = vpop.f32.mrf.mxu1 }
 0x1b9   :  { %v1674_v39 = vadd.f32 %v3475_v42, %v1625_v14 }
 0x1bb   :  { %v1768_v63 = vpop.f32.mrf.mxu2  ;;  %v1723_v8 = vadd.f32 %v1722_v60, %v1674_v39  ;;  %v2632_v60 = vld [vmem:[%s3702_s6 + $0x10] sm:$0xff] }
 0x1bc   :  { %v3564_v44 = vadd.f32 %v1768_v63, %v1720_v2 }
 0x1be   :  { %v1626_v55 = vpop.f32.mrf.mxu3 }
 0x1bf   :  { %v1627_v13 = vadd.f32 %v1626_v55, %v3458_v29 }
 0x1c0   :  { %2541 = vmatmul.msk.bf16.gmra.mxu2 %vm2010_vm14, %v2631_v17 }
 0x1c1   :  { %v1676_v36 = vadd.f32 %v3485_v59, %v1627_v13  ;;  %v929_v59 = vpack.c.b16 %v3369_v58, %v903_v47  ;;  %v2633_v58 = vld [vmem:[%s3702_s6 + $0x18] sm:$0xff]  ;;  %v1695_v47 = vpop.f32.mrf.mxu0 }
 0x1c3   :  { %v1771_v35 = vpop.f32.mrf.mxu2  ;;  %1824 = vmatmul.bf16.gmra.mxu3 %v3070_v6  ;;  %1942 = vmatmul.bf16.gmra.mxu1 %v3358_v37  ;;  %v1725_v27 = vadd.f32 %v3520_v45, %v1676_v36  ;;  %v1739_v6 = vpop.f32.mrf.mxu1 }
 0x1c4   :  { %v3574_v3 = vadd.f32 %v1771_v35, %v1723_v8 }
 0x1c6   :  { %v1629_v18 = vpop.f32.mrf.mxu3 }
 0x1c7   :  { %v1630_v42 = vadd.f32 %v1629_v18, %v3452_v19  ;;  %v920_v19 = vpack.c.b16 %v2841_v34, %v3092_v38 }
 0x1c9   :  { %v1679_v37 = vadd.f32 %v3499_v4, %v1630_v42  ;;  %v1698_v39 = vpop.f32.mrf.mxu0 }
 0x1cb   :  { %v1773_v29 = vpop.f32.mrf.mxu2  ;;  %v1728_v45 = vadd.f32 %v3534_v23, %v1679_v37  ;;  %v1742_v49 = vpop.f32.mrf.mxu1 }
 0x1cc   :  { %v3579_v22 = vadd.f32 %v1773_v29, %v1725_v27 }
 0x1ce   :  { %v1631_v40 = vpop.f32.mrf.mxu3 }
 0x1cf   :  { %v1632_v5 = vadd.f32 %v1631_v40, %v3463_v12 }
 0x1d0   :  { %2542 = vmatmul.msk.bf16.gmra.mxu2 %vm2010_vm14, %v2632_v60 }
 0x1d1   :  { %v1681_v4 = vadd.f32 %v3511_v21, %v1632_v5 }
 0x1d3   :  { %v1776_v7 = vpop.f32.mrf.mxu2  ;;  %1829 = vmatmul.bf16.gmra.mxu3 %v920_v19  ;;  %1947 = vmatmul.bf16.gmra.mxu1 %v929_v59  ;;  %v1730_v38 = vadd.f32 %v3544_v54, %v1681_v4  ;;  %v1744_v21 = vpop.f32.mrf.mxu1 }
 0x1d4   :  { %v3593_v10 = vadd.f32 %v1776_v7, %v1728_v45 }
 0x1d6   :  { %v1634_v12 = vpop.f32.mrf.mxu3 }
 0x1d7   :  { %v1635_v62 = vadd.f32 %v1634_v12, %v3473_v61 }
 0x1d9   :  { %v1684_v23 = vadd.f32 %v3517_v0, %v1635_v62 }
 0x1db   :  { %v1778_v25 = vpop.f32.mrf.mxu2  ;;  %v1733_v2 = vadd.f32 %v1732_v57, %v1684_v23  ;;  %v1747_v0 = vpop.f32.mrf.mxu1 }
 0x1dc   :  { %v3598_v48 = vadd.f32 %v1778_v25, %v1730_v38 }
 0x1de   :  { %v1636_v20 = vpop.f32.mrf.mxu3 }
 0x1df   :  { %v1637_v14 = vadd.f32 %v1636_v20, %v3482_v30  ;;  %v2634_v30 = vld [vmem:[%s3702_s6 + $0x20] sm:$0xff] }
 0x1e0   :  { %2543 = vmatmul.msk.bf16.gmra.mxu2 %vm2010_vm14, %v2633_v58 }
 0x1e1   :  { %v1686_v63 = vadd.f32 %v3531_v31, %v1637_v14  ;;  %v1700_v31 = vpop.f32.mrf.mxu0 }
 0x1e3   :  { %v1781_v61 = vpop.f32.mrf.mxu2  ;;  %1834 = vmatmul.bf16.gmra.mxu3 %v3194_v15  ;;  %v1735_v13 = vadd.f32 %v1734_v43, %v1686_v63  ;;  %v1749_v43 = vpop.f32.mrf.mxu1 }
 0x1e4   :  { %v3607_v54 = vadd.f32 %v1781_v61, %v1733_v2 }
 0x1e6   :  { %v1639_v17 = vpop.f32.mrf.mxu3 }
 0x1e7   :  { %v1640_v55 = vadd.f32 %v1639_v17, %v3492_v26 }
 0x1e9   :  { %v1689_v57 = vadd.f32 %v1688_v53, %v1640_v55  ;;  %v1703_v40 = vpop.f32.mrf.mxu0 }
 0x1eb   :  { %v1783_v8 = vpop.f32.mrf.mxu2  ;;  %v1738_v18 = vadd.f32 %v1737_v51, %v1689_v57  ;;  %v1752_v59 = vpop.f32.mrf.mxu1 }
 0x1ec   :  { %v3611_v35 = vadd.f32 %v1783_v8, %v1735_v13 }
 0x1ee   :  { %v1641_v36 = vpop.f32.mrf.mxu3 }
 0x1ef   :  { %v1642_v15 = vadd.f32 %v1641_v36, %v3501_v52  ;;  %v2635_v52 = vld [vmem:[%s3702_s6 + $0x28] sm:$0xff] }
 0x1f0   :  { %2544 = vmatmul.msk.bf16.gmra.mxu2 %vm2010_vm14, %v2634_v30 }
 0x1f1   :  { %v1691_v27 = vadd.f32 %v1690_v24, %v1642_v15 }
 0x1f3   :  { %v1786_v42 = vpop.f32.mrf.mxu2  ;;  %1839 = vmatmul.bf16.gmra.mxu3 %v3274_v9  ;;  %v1740_v37 = vadd.f32 %v1739_v6, %v1691_v27  ;;  %v1705_v6 = vpop.f32.mrf.mxu0 }
 0x1f4   :  { %v3619_v26 = vadd.f32 %v1786_v42, %v1738_v18  ;;  %v1754_v62 = vpop.f32.mrf.mxu1 }
 0x1f6   :  { %v1644_v29 = vpop.f32.mrf.mxu3 }
 0x1f7   :  { %v1645_v60 = vadd.f32 %v1644_v29, %v3509_v56 }
 0x1f9   :  { %v1694_v51 = vadd.f32 %v1693_v16, %v1645_v60 }
 0x1fb   :  { %v1788_v53 = vpop.f32.mrf.mxu2  ;;  %v1743_v24 = vadd.f32 %v1742_v49, %v1694_v51  ;;  %v1864_v23 = vpop.f32.mrf.mxu0 }
 0x1fc   :  { %v3622_v5 = vadd.f32 %v1788_v53, %v1740_v37  ;;  %v1913_v20 = vpop.f32.mrf.mxu1 }
 0x1fe   :  { %v1646_v19 = vpop.f32.mrf.mxu3 }
 0x1ff   :  { %v1647_v9 = vadd.f32 %v1646_v19, %v3515_v32  ;;  %v2636_v32 = vld [vmem:[%s3702_s6 + $0x30] sm:$0xff] }
 0x200   :  { %2545 = vmatmul.msk.bf16.gmra.mxu2 %vm2010_vm14, %v2635_v52 }
 0x201   :  { %v1696_v7 = vadd.f32 %v1695_v47, %v1647_v9  ;;  %v921_v47 = vpack.c.b16 %v2841_v34, %v3346_v50 }
 0x203   :  { %v1791_v45 = vpop.f32.mrf.mxu2  ;;  %1844 = vmatmul.bf16.gmra.mxu3 %v3330_v28  ;;  %v1745_v38 = vadd.f32 %v1744_v21, %v1696_v7  ;;  %v1866_v17 = vpop.f32.mrf.mxu0 }
 0x204   :  { %v3630_v56 = vadd.f32 %v1791_v45, %v1743_v24  ;;  %v1915_v34 = vpop.f32.mrf.mxu1 }
 0x206   :  { %v1649_v4 = vpop.f32.mrf.mxu3 }
 0x207   :  { %v1650_v12 = vadd.f32 %v1649_v4, %v3527_v11 }
 0x209   :  { %v1699_v49 = vadd.f32 %v1698_v39, %v1650_v12 }
 0x20b   :  { %v1793_v16 = vpop.f32.mrf.mxu2  ;;  %v1748_v11 = vadd.f32 %v1747_v0, %v1699_v49  ;;  %v1869_v57 = vpop.f32.mrf.mxu0 }
 0x20c   :  { %v3633_v25 = vadd.f32 %v1793_v16, %v1745_v38  ;;  %v1918_v18 = vpop.f32.mrf.mxu1 }
 0x20e   :  { %v1651_v58 = vpop.f32.mrf.mxu3 }
 0x20f   :  { %v1652_v28 = vadd.f32 %v1651_v58, %v3536_v1  ;;  %v2637_v1 = vld [vmem:[%s3702_s6 + $0x38] sm:$0xff] }
 0x210   :  { %2546 = vmatmul.msk.bf16.gmra.mxu2 %vm2010_vm14, %v2636_v32 }
 0x211   :  { %v1701_v2 = vadd.f32 %v1700_v31, %v1652_v28 }
 0x213   :  { %v1796_v14 = vpop.f32.mrf.mxu2  ;;  %1849 = vmatmul.bf16.gmra.mxu3 %v921_v47  ;;  %v1750_v39 = vadd.f32 %v1749_v43, %v1701_v2  ;;  %v1871_v29 = vpop.f32.mrf.mxu0 }
 0x214   :  { %v3642_v21 = vadd.f32 %v1796_v14, %v1748_v11 }
 0x216   :  { %v1654_v61 = vpop.f32.mrf.mxu3 }
 0x217   :  { %v1655_v63 = vadd.f32 %v1654_v61, %v3542_v33 }
 0x219   :  { %v1704_v50 = vadd.f32 %v1703_v40, %v1655_v63  ;;  %v1920_v40 = vpop.f32.mrf.mxu1 }
 0x21b   :  { %v1798_v55 = vpop.f32.mrf.mxu2  ;;  %v1753_v30 = vadd.f32 %v1752_v59, %v1704_v50  ;;  %v1874_v59 = vpop.f32.mrf.mxu0 }
 0x21c   :  { %v3645_v13 = vadd.f32 %v1798_v55, %v1750_v39 }
 0x21e   :  { %v1656_v0 = vpop.f32.mrf.mxu3 }
 0x21f   :  { %v1657_v8 = vadd.f32 %v1656_v0, %v3548_v41 }
 0x220   :  { %2547 = vmatmul.msk.bf16.gmra.mxu2 %vm2010_vm14, %v2637_v1 }
 0x221   :  { %v1706_v15 = vadd.f32 %v1705_v6, %v1657_v8  ;;  %v1923_v6 = vpop.f32.mrf.mxu1 }
 0x223   :  { %v1801_v36 = vpop.f32.mrf.mxu2  ;;  %v1755_v42 = vadd.f32 %v1754_v62, %v1706_v15  ;;  %v1876_v32 = vpop.f32.mrf.mxu0 }
 0x224   :  { %v3652_v33 = vadd.f32 %v1801_v36, %v1753_v30 }
 0x226   :  { %v1815_v31 = vpop.f32.mrf.mxu3 }
 0x227   :  { %v1816_v37 = vadd.f32 %v1815_v31, %v3559_v46 }
 0x229   :  { %v1865_v52 = vadd.f32 %v1864_v23, %v1816_v37  ;;  %v1925_v23 = vpop.f32.mrf.mxu1 }
 0x22b   :  { %v1803_v43 = vpop.f32.mrf.mxu2  ;;  %v1914_v9 = vadd.f32 %v1913_v20, %v1865_v52  ;;  %v1879_v2 = vpop.f32.mrf.mxu0 }
 0x22c   :  { %v3654_v27 = vadd.f32 %v1803_v43, %v1755_v42 }
 0x22e   :  { %v1817_v60 = vpop.f32.mrf.mxu3 }
 0x22f   :  { %v1818_v41 = vadd.f32 %v1817_v60, %v3564_v44 }
 0x231   :  { %v1867_v51 = vadd.f32 %v1866_v17, %v1818_v41  ;;  %v1928_v55 = vpop.f32.mrf.mxu1 }
 0x233   :  { %v2047_v53 = vpop.f32.mrf.mxu2  ;;  %v1916_v45 = vadd.f32 %v1915_v34, %v1867_v51  ;;  %v1881_v8 = vpop.f32.mrf.mxu0 }
 0x234   :  { %v2087_v24 = vadd.f32 %v2047_v53, %v1914_v9 }
 0x236   :  { %v1820_v19 = vpop.f32.mrf.mxu3  ;;  %v2103_v12 = vmax.f32 %v2087_v24, 0.0 }
 0x237   :  { %v1821_v16 = vadd.f32 %v1820_v19, %v3574_v3 }
 0x239   :  { %v1870_v58 = vadd.f32 %v1869_v57, %v1821_v16  ;;  %v1930_v15 = vpop.f32.mrf.mxu1 }
 0x23b   :  { %v2049_v7 = vpop.f32.mrf.mxu2  ;;  %v1919_v11 = vadd.f32 %v1918_v18, %v1870_v58  ;;  %v1884_v37 = vpop.f32.mrf.mxu0 }
 0x23c   :  { %v2088_v4 = vadd.f32 %v2049_v7, %v1916_v45 }
 0x23e   :  { %v2104_v62 = vmax.f32 %v2088_v4, 0.0  ;;  %v1822_v38 = vpop.f32.mrf.mxu3 }
 0x23f   :  { %v1823_v44 = vadd.f32 %v1822_v38, %v3579_v22 }
 0x240   :  { %v2641_v46 = vpack.c.bf16 %v2104_v62, %v2103_v12 }
 0x241   :  { %v1872_v28 = vadd.f32 %v1871_v29, %v1823_v44  ;;  %v1933_v53 = vpop.f32.mrf.mxu1 }
 0x242   :  { %2642 = vst [vmem:[%s3703_s7] sm:$0xff] %v2641_v46  }
 0x243   :  { %v2052_v49 = vpop.f32.mrf.mxu2  ;;  %v1921_v14 = vadd.f32 %v1920_v40, %v1872_v28  ;;  %v1886_v24 = vpop.f32.mrf.mxu0 }
 0x244   :  { %v2089_v20 = vadd.f32 %v2052_v49, %v1919_v11 }
 0x246   :  { %v1825_v47 = vpop.f32.mrf.mxu3  ;;  %v2105_v3 = vmax.f32 %v2089_v20, 0.0 }
 0x247   :  { %v1826_v1 = vadd.f32 %v1825_v47, %v3593_v10 }
 0x249   :  { %v1875_v0 = vadd.f32 %v1874_v59, %v1826_v1  ;;  %v1935_v12 = vpop.f32.mrf.mxu1 }
 0x24b   :  { %v2054_v61 = vpop.f32.mrf.mxu2  ;;  %v1924_v36 = vadd.f32 %v1923_v6, %v1875_v0 }
 0x24c   :  { %v2090_v63 = vadd.f32 %v2054_v61, %v1921_v14 }
 0x24e   :  { %v2106_v17 = vmax.f32 %v2090_v63, 0.0  ;;  %v1827_v39 = vpop.f32.mrf.mxu3 }
 0x24f   :  { %v1828_v22 = vadd.f32 %v1827_v39, %v3598_v48 }
 0x250   :  { %v2646_v34 = vpack.c.bf16 %v2106_v17, %v2105_v3 }
 0x251   :  { %v1877_v30 = vadd.f32 %v1876_v32, %v1828_v22  ;;  %v1889_v32 = vpop.f32.mrf.mxu0  ;;  %v1938_v28 = vpop.f32.mrf.mxu1 }
 0x252   :  { %2678 = vst [vmem:[%s3703_s7 + $0x8] sm:$0xff] %v2646_v34  }
 0x253   :  { %v2057_v50 = vpop.f32.mrf.mxu2  ;;  %v1926_v18 = vadd.f32 %v1925_v23, %v1877_v30 }
 0x254   :  { %v2091_v31 = vadd.f32 %v2057_v50, %v1924_v36 }
 0x256   :  { %v1830_v57 = vpop.f32.mrf.mxu3  ;;  %v2107_v29 = vmax.f32 %v2091_v31, 0.0 }
 0x257   :  { %v1831_v40 = vadd.f32 %v1830_v57, %v3607_v54 }
 0x259   :  { %v1880_v51 = vadd.f32 %v1879_v2, %v1831_v40  ;;  %v1891_v61 = vpop.f32.mrf.mxu0 }
 0x25b   :  { %v2059_v42 = vpop.f32.mrf.mxu2  ;;  %v1929_v9 = vadd.f32 %v1928_v55, %v1880_v51  ;;  %v1940_v55 = vpop.f32.mrf.mxu1 }
 0x25c   :  { %v2092_v43 = vadd.f32 %v2059_v42, %v1926_v18 }
 0x25e   :  { %v2108_v10 = vmax.f32 %v2092_v43, 0.0  ;;  %v1832_v60 = vpop.f32.mrf.mxu3 }
 0x25f   :  { %v1833_v48 = vadd.f32 %v1832_v60, %v3611_v35 }
 0x260   :  { %v2651_v41 = vpack.c.bf16 %v2108_v10, %v2107_v29 }
 0x261   :  { %v1882_v19 = vadd.f32 %v1881_v8, %v1833_v48  ;;  %v1894_v0 = vpop.f32.mrf.mxu0 }
 0x262   :  { %2679 = vst [vmem:[%s3703_s7 + $0x10] sm:$0xff] %v2651_v41  }
 0x263   :  { %v2062_v52 = vpop.f32.mrf.mxu2  ;;  %v1931_v6 = vadd.f32 %v1930_v15, %v1882_v19  ;;  %v1943_v36 = vpop.f32.mrf.mxu1 }
 0x264   :  { %v2093_v45 = vadd.f32 %v2062_v52, %v1929_v9 }
 0x266   :  { %v1835_v59 = vpop.f32.mrf.mxu3  ;;  %v2109_v54 = vmax.f32 %v2093_v45, 0.0 }
 0x267   :  { %v1836_v16 = vadd.f32 %v1835_v59, %v3619_v26 }
 0x269   :  { %v1885_v49 = vadd.f32 %v1884_v37, %v1836_v16  ;;  %v1896_v10 = vpop.f32.mrf.mxu0 }
 0x26b   :  { %v2064_v7 = vpop.f32.mrf.mxu2  ;;  %v1934_v47 = vadd.f32 %v1933_v53, %v1885_v49  ;;  %v1945_v40 = vpop.f32.mrf.mxu1 }
 0x26c   :  { %v2094_v4 = vadd.f32 %v2064_v7, %v1931_v6 }
 0x26e   :  { %v2110_v62 = vmax.f32 %v2094_v4, 0.0  ;;  %v1837_v38 = vpop.f32.mrf.mxu3 }
 0x26f   :  { %v1838_v35 = vadd.f32 %v1837_v38, %v3622_v5 }
 0x270   :  { %v2656_v46 = vpack.c.bf16 %v2110_v62, %v2109_v54 }
 0x271   :  { %v1887_v58 = vadd.f32 %v1886_v24, %v1838_v35  ;;  %v1899_v19 = vpop.f32.mrf.mxu0 }
 0x272   :  { %2680 = vst [vmem:[%s3703_s7 + $0x18] sm:$0xff] %v2656_v46  }
 0x273   :  { %v2067_v44 = vpop.f32.mrf.mxu2  ;;  %v1936_v20 = vadd.f32 %v1935_v12, %v1887_v58  ;;  %v1948_v45 = vpop.f32.mrf.mxu1 }
 0x274   :  { %v2095_v11 = vadd.f32 %v2067_v44, %v1934_v47 }
 0x276   :  { %v1840_v23 = vpop.f32.mrf.mxu3  ;;  %v2111_v26 = vmax.f32 %v2095_v11, 0.0 }
 0x277   :  { %v1841_v17 = vadd.f32 %v1840_v23, %v3630_v56 }
 0x279   :  { %v1890_v34 = vadd.f32 %v1889_v32, %v1841_v17  ;;  %v1901_v62 = vpop.f32.mrf.mxu0 }
 0x27b   :  { %v2069_v14 = vpop.f32.mrf.mxu2  ;;  %v1939_v8 = vadd.f32 %v1938_v28, %v1890_v34  ;;  %v1950_v46 = vpop.f32.mrf.mxu1 }
 0x27c   :  { %v2096_v2 = vadd.f32 %v2069_v14, %v1936_v20 }
 0x27e   :  { %v2112_v63 = vmax.f32 %v2096_v2, 0.0  ;;  %v1842_v3 = vpop.f32.mrf.mxu3 }
 0x27f   :  { %v1843_v5 = vadd.f32 %v1842_v3, %v3633_v25 }
 0x280   :  { %v2661_v39 = vpack.c.bf16 %v2112_v63, %v2111_v26 }
 0x281   :  { %v1892_v22 = vadd.f32 %v1891_v61, %v1843_v5 }
 0x282   :  { %2681 = vst [vmem:[%s3703_s7 + $0x20] sm:$0xff] %v2661_v39  }
 0x283   :  { %v2072_v1 = vpop.f32.mrf.mxu2  ;;  %v1941_v57 = vadd.f32 %v1940_v55, %v1892_v22 }
 0x284   :  { %v2097_v30 = vadd.f32 %v2072_v1, %v1939_v8 }
 0x286   :  { %v1845_v50 = vpop.f32.mrf.mxu3  ;;  %v2113_v56 = vmax.f32 %v2097_v30, 0.0 }
 0x287   :  { %v1846_v43 = vadd.f32 %v1845_v50, %v3642_v21 }
 0x289   :  { %v1895_v37 = vadd.f32 %v1894_v0, %v1846_v43 }
 0x28b   :  { %v2074_v15 = vpop.f32.mrf.mxu2  ;;  %v1944_v53 = vadd.f32 %v1943_v36, %v1895_v37 }
 0x28c   :  { %v2098_v31 = vadd.f32 %v2074_v15, %v1941_v57 }
 0x28e   :  { %v2114_v18 = vmax.f32 %v2098_v31, 0.0  ;;  %v1847_v42 = vpop.f32.mrf.mxu3 }
 0x28f   :  { %v1848_v25 = vadd.f32 %v1847_v42, %v3645_v13 }
 0x290   :  { %v2666_v29 = vpack.c.bf16 %v2114_v18, %v2113_v56 }
 0x291   :  { %v1897_v41 = vadd.f32 %v1896_v10, %v1848_v25 }
 0x292   :  { %2682 = vst [vmem:[%s3703_s7 + $0x28] sm:$0xff] %v2666_v29  }
 0x293   :  { %v2077_v60 = vpop.f32.mrf.mxu2  ;;  %v1946_v51 = vadd.f32 %v1945_v40, %v1897_v41 }
 0x294   :  { %v2099_v52 = vadd.f32 %v2077_v60, %v1944_v53 }
 0x296   :  { %v1850_v48 = vpop.f32.mrf.mxu3  ;;  %v2115_v21 = vmax.f32 %v2099_v52, 0.0 }
 0x297   :  { %v1851_v7 = vadd.f32 %v1850_v48, %v3652_v33 }
 0x299   :  { %v1900_v54 = vadd.f32 %v1899_v19, %v1851_v7 }
 0x29b   :  { %v2079_v59 = vpop.f32.mrf.mxu2  ;;  %v1949_v16 = vadd.f32 %v1948_v45, %v1900_v54 }
 0x29c   :  { %v2100_v9 = vadd.f32 %v2079_v59, %v1946_v51 }
 0x29e   :  { %v2116_v24 = vmax.f32 %v2100_v9, 0.0  ;;  %v1852_v6 = vpop.f32.mrf.mxu3 }
 0x29f   :  { %v1853_v13 = vadd.f32 %v1852_v6, %v3654_v27 }
 0x2a0   :  { %v2671_v4 = vpack.c.bf16 %v2116_v24, %v2115_v21 }
 0x2a1   :  { %v1902_v38 = vadd.f32 %v1901_v62, %v1853_v13 }
 0x2a2   :  { %2683 = vst [vmem:[%s3703_s7 + $0x30] sm:$0xff] %v2671_v4  }
 0x2a3   :  { %v2082_v12 = vpop.f32.mrf.mxu2  ;;  %v1951_v32 = vadd.f32 %v1950_v46, %v1902_v38 }
 0x2a4   :  { %v2101_v35 = vadd.f32 %v2082_v12, %v1949_v16 }
 0x2a6   :  { %v2117_v58 = vmax.f32 %v2101_v35, 0.0 }
 0x2ab   :  { %v2084_v44 = vpop.f32.mrf.mxu2 }
 0x2ac   :  { %v2102_v49 = vadd.f32 %v2084_v44, %v1951_v32 }
 0x2ae   :  { %v2118_v23 = vmax.f32 %v2102_v49, 0.0 }
 0x2b0   :  { %v2676_v33 = vpack.c.bf16 %v2118_v23, %v2117_v58 }
 0x2b2   :  { %2684 = vst [vmem:[%s3703_s7 + $0x38] sm:$0xff] %v2676_v33  }

</bundles_post_ra>
